<compile_context>
chip_gen: v7x
topology: tpu7x:2x2x1
jax: 0.10.0
libtpu: 0.0.40
codegen_flags: <defaults>
</compile_context>

<pallas_src>
import functools

import jax
import jax.numpy as jnp
from jax.experimental import pallas as pl
from jax.experimental.pallas import tpu as pltpu

BN_EPS = 1e-3  # nn.BatchNorm2d(nOut, eps=0.001)


def _conv_kernel(x_ref, w_ref, *out_refs, KH, KW, sh, sw, dh, dw, TH, Wout, Cout):
    """One grid step = (image n, output-row band ht); full KH*KW*Cin contraction per step.

    x_ref       : (1, Hp, Wp, Cin)      bf16  -- whole padded image (resident across ht)
    w_ref       : (KH, KW, Cin, Coutp)  bf16  -- full weight (resident across grid)
    out_refs[0] : (1, TH, Wout, Cout)         -- conv output band (f32, or bf16 when bn_acti)
    out_refs[1] : (1, 1, 2, Coutp)      f32   -- optional per-band [sum; sum_sq] (BN pass 1)
    """
    o_ref = out_refs[0]

    ht = pl.program_id(1)
    base = pl.multiple_of(ht * (TH * sh), TH * sh)          # first padded input row of this band
    BH = (TH - 1) * sh + (KH - 1) * dh + 1                  # band height incl. conv halo
    band = x_ref[0, pl.ds(base, BH)]                        # (BH, Wp, Cin) bf16

    acc = None                                              # (TH*Wout, Coutp) f32
    for i in range(KH):
        # TODO(synk): for sh > 1 this is a sublane-strided value slice; a strided DMA
        #             (pl.ds(..., stride=sh)) would avoid the per-step relayout.
        rows = band[i * dh: i * dh + (TH - 1) * sh + 1: sh]             # (TH, Wp, Cin)
        for j in range(KW):
            win = rows[:, j * dw: j * dw + (Wout - 1) * sw + 1: sw, :]  # (TH, Wout, Cin)
            lhs = win.reshape(TH * Wout, win.shape[-1])
            contrib = jnp.dot(lhs, w_ref[i, j], preferred_element_type=jnp.float32)
            acc = contrib if acc is None else acc + contrib

    o_ref[0] = acc[:, :Cout].reshape(TH, Wout, Cout).astype(o_ref.dtype)

    if len(out_refs) > 1:                                   # bn_acti: per-band batch statistics
        stats_ref = out_refs[1]
        stats_ref[0, 0] = jnp.concatenate(
            [jnp.sum(acc, axis=0, keepdims=True),
             jnp.sum(acc * acc, axis=0, keepdims=True)], axis=0)        # (2, Coutp)


def _bn_prelu_kernel(y_ref, scale_ref, shift_ref, alpha_ref, o_ref):
    """Elementwise BN-apply + per-channel PReLU (pass 2), one TH-row band per step."""
    z = y_ref[0].astype(jnp.float32) * scale_ref[...] + shift_ref[...]  # (TH, Wout, Cout)
    o_ref[0] = jnp.where(z >= 0, z, alpha_ref[...] * z)


def _largest_divisor_at_most(n, cap):
    cap = max(1, min(n, cap))
    for t in range(cap, 0, -1):
        if n % t == 0:
            return t
    return 1


def conv_bn_prelu(x_nchw, weight, gamma, beta, alpha, *, stride, padding, dilation, bn_acti):
    """Equivalent of Conv(nIn, nOut, kSize, stride, padding, dilation, groups=1, bn_acti, bias=False)."""
    N, Cin, H, W = x_nchw.shape
    Cout, Cin_w, KH, KW = weight.shape
    assert Cin_w == Cin, "only groups=1 supported"   # TODO(synk): groups > 1 not implemented
    sh, sw = stride
    ph, pw = padding
    dh, dw = dilation
    Hout = (H + 2 * ph - dh * (KH - 1) - 1) // sh + 1
    Wout = (W + 2 * pw - dw * (KW - 1) - 1) // sw + 1
    Hp, Wp = H + 2 * ph, W + 2 * pw
    Coutp = ((Cout + 127) // 128) * 128              # lane-dense padded channels for the MXU RHS

    # Output-row band size: largest divisor of Hout keeping M = TH*Wout around the MXU tile.
    TH = _largest_divisor_at_most(Hout, max(1, 256 // max(1, Wout)))
    HT = Hout // TH

    # ---- layout prep (cheap; NO im2col expansion) ----
    xp = jnp.transpose(x_nchw, (0, 2, 3, 1))                              # NHWC
    xp = jnp.pad(xp, ((0, 0), (ph, ph), (pw, pw), (0, 0))).astype(jnp.bfloat16)   # (N, Hp, Wp, Cin)
    # PyTorch weight (Cout, Cin, KH, KW) -> (KH, KW, Cin, Coutp)
    w = jnp.transpose(weight, (2, 3, 1, 0))
    w = jnp.pad(w, ((0, 0), (0, 0), (0, 0), (0, Coutp - Cout))).astype(jnp.bfloat16)

    kernel1 = functools.partial(_conv_kernel, KH=KH, KW=KW, sh=sh, sw=sw, dh=dh, dw=dw,
                                TH=TH, Wout=Wout, Cout=Cout)

    y_dtype = jnp.bfloat16 if bn_acti else jnp.float32        # bf16 intermediate when bn follows
    y_sds = jax.ShapeDtypeStruct((N, Hout, Wout, Cout), y_dtype)
    y_spec = pl.BlockSpec((1, TH, Wout, Cout), lambda n, ht: (n, ht, 0, 0))

    in_specs = [
        # whole padded image; ht-invariant index map -> fetched once per n, resident across ht.
        pl.BlockSpec((1, Hp, Wp, Cin), lambda n, ht: (n, 0, 0, 0)),
        # full weight, resident across the whole grid (constant index map).
        pl.BlockSpec((KH, KW, Cin, Coutp), lambda n, ht: (0, 0, 0, 0)),
    ]

    if bn_acti:
        out_shape = (y_sds, jax.ShapeDtypeStruct((N, HT, 2, Coutp), jnp.float32))
        out_specs = (y_spec, pl.BlockSpec((1, 1, 2, Coutp), lambda n, ht: (n, ht, 0, 0)))
    else:
        out_shape = y_sds
        out_specs = y_spec

    # Explicit VMEM budget (double-buffered image + resident weight + outputs + accumulator).
    img_b = Hp * Wp * Cin * 2
    w_b = KH * KW * Cin * Coutp * 2
    out_b = TH * Wout * Cout * (2 if bn_acti else 4)
    acc_b = TH * Wout * Coutp * 4
    need = 2 * img_b + w_b + 2 * out_b + 2 * (2 * Coutp * 4) + acc_b + (1 << 20)
    vmem_limit = int(min(64 << 20, max(16 << 20, 2 * need)))

    flops = int(2 * N * Hout * Wout * KH * KW * Cin * Cout)
    bytes_accessed = int(xp.size * 2 + w.size * 2
                         + N * Hout * Wout * Cout * (2 if bn_acti else 4))

    conv_out = pl.pallas_call(
        kernel1,
        out_shape=out_shape,
        grid=(N, HT),
        in_specs=in_specs,
        out_specs=out_specs,
        compiler_params=pltpu.CompilerParams(
            dimension_semantics=("parallel", "parallel"),   # no reduction axis -> megacore OK
            vmem_limit_bytes=vmem_limit),
        cost_estimate=pl.CostEstimate(flops=flops, transcendentals=0,
                                      bytes_accessed=bytes_accessed),
    )(xp, w)

    if bn_acti:
        y, stats = conv_out
        s = jnp.sum(stats, axis=(0, 1))[:, :Cout]           # tiny (2, Cout) reduce in the wrapper
        cnt = float(N * Hout * Wout)
        mean = s[0] / cnt
        var = jnp.maximum(s[1] / cnt - mean * mean, 0.0)     # biased variance (training-mode BN)
        gamma_f = gamma.astype(jnp.float32)
        inv_std = jax.lax.rsqrt(var + BN_EPS)
        scale = (gamma_f * inv_std).reshape(1, Cout)
        shift = (beta.astype(jnp.float32) - mean * gamma_f * inv_std).reshape(1, Cout)
        alpha2 = alpha.astype(jnp.float32).reshape(1, Cout)

        y = pl.pallas_call(
            _bn_prelu_kernel,
            out_shape=jax.ShapeDtypeStruct((N, Hout, Wout, Cout), jnp.float32),
            grid=(N, HT),
            in_specs=[
                pl.BlockSpec((1, TH, Wout, Cout), lambda n, ht: (n, ht, 0, 0)),
                pl.BlockSpec((1, Cout), lambda n, ht: (0, 0)),
                pl.BlockSpec((1, Cout), lambda n, ht: (0, 0)),
                pl.BlockSpec((1, Cout), lambda n, ht: (0, 0)),
            ],
            out_specs=pl.BlockSpec((1, TH, Wout, Cout), lambda n, ht: (n, ht, 0, 0)),
            compiler_params=pltpu.CompilerParams(
                dimension_semantics=("parallel", "parallel")),
        )(y, scale, shift, alpha2)
    else:
        y = conv_out

    # Un-padded NHWC -> PyTorch NCHW: one small XLA transpose of the final tensor.
    # TODO(synk): could be fused by having pass 2 write NCHW blocks directly.
    return jnp.transpose(y, (0, 3, 1, 2))


if __name__ == "__main__":
    key = jax.random.PRNGKey(0)
    k1, k2, k3, k4 = jax.random.split(key, 4)

    # Shapes consistent with Conv(nIn=4, nOut=8, kSize=3, stride=1, padding=1, bn_acti=True)
    N, Cin, H, W = 2, 4, 16, 16
    Cout, KH, KW = 8, 3, 3
    stride, padding, dilation = (1, 1), (1, 1), (1, 1)

    x = jax.random.normal(k1, (N, Cin, H, W), jnp.float32)
    fan_in = Cin * KH * KW
    bound = 1.0 / (fan_in ** 0.5)
    weight = jax.random.uniform(k2, (Cout, Cin, KH, KW), jnp.float32, -bound, bound)
    gamma = 1.0 + 0.1 * jax.random.normal(k3, (Cout,), jnp.float32)   # BN weight
    beta = 0.1 * jax.random.normal(k4, (Cout,), jnp.float32)          # BN bias
    alpha = jnp.full((Cout,), 0.25, jnp.float32)                      # PReLU default init

    out = conv_bn_prelu(x, weight, gamma, beta, alpha,
                        stride=stride, padding=padding, dilation=dilation, bn_acti=True)
    out = jax.block_until_ready(out)
    assert out.shape == (N, Cout, H, W)

    out_conv = conv_bn_prelu(x, weight, gamma, beta, alpha,
                             stride=stride, padding=padding, dilation=dilation, bn_acti=False)
    out_conv = jax.block_until_ready(out_conv)
    assert out_conv.shape == (N, Cout, H, W)

    # Pure-JAX reference.  Operands are bf16-quantized to mirror the kernel's intentional bf16
    # MXU inputs (f32 accumulation in both), then conv + training-mode BN + PReLU in f32.
    xq = x.astype(jnp.bfloat16).astype(jnp.float32)
    wq = weight.astype(jnp.bfloat16).astype(jnp.float32)
    ref_conv = jax.lax.conv_general_dilated(
        xq, wq, window_strides=stride, padding=[(1, 1), (1, 1)],
        rhs_dilation=dilation, dimension_numbers=("NCHW", "OIHW", "NCHW"))
    mean = ref_conv.mean(axis=(0, 2, 3), keepdims=True)
    var = ((ref_conv - mean) ** 2).mean(axis=(0, 2, 3), keepdims=True)
    z = (gamma.reshape(1, -1, 1, 1) * (ref_conv - mean) * jax.lax.rsqrt(var + BN_EPS)
         + beta.reshape(1, -1, 1, 1))
    ref = jnp.where(z >= 0, z, alpha.reshape(1, -1, 1, 1) * z)

    err_bn = float(jnp.max(jnp.abs(out - ref)))
    err_cv = float(jnp.max(jnp.abs(out_conv - ref_conv)))
    assert jnp.allclose(out, ref, atol=2e-2, rtol=2e-2), f"bn_acti=True max abs err {err_bn}"
    assert jnp.allclose(out_conv, ref_conv, atol=2e-2, rtol=2e-2), f"bn_acti=False max abs err {err_cv}"
    print("KERNEL_OK")
</pallas_src>

<mosaic_0001>
module attributes {stable_mosaic.version = 11 : i64} {
  func.func @_conv_kernel(%arg0: i32, %arg1: i32, %arg2: memref<1x18x18x4xbf16, #tpu.memory_space<vmem>>, %arg3: memref<3x3x4x128xbf16, #tpu.memory_space<vmem>>, %arg4: memref<1x16x16x8xbf16, #tpu.memory_space<vmem>>, %arg5: memref<1x1x2x128xf32, #tpu.memory_space<vmem>>) attributes {dimension_semantics = [#tpu.dimension_semantics<parallel>, #tpu.dimension_semantics<parallel>], iteration_bounds = array<i64: 2, 1>, scalar_prefetch = 0 : i64, scratch_operands = 0 : i64, tpu.core_type = #tpu.core_type<tc>, window_params = [{transform_indices = @transform_0, window_bounds = array<i64: 1, 18, 18, 4>}, {pipeline_mode = #tpu.pipeline_mode<synchronous>, transform_indices = @transform_1, window_bounds = array<i64: 3, 3, 4, 128>}, {transform_indices = @transform_2, window_bounds = array<i64: 1, 16, 16, 8>}, {transform_indices = @transform_3, window_bounds = array<i64: 1, 1, 2, 128>}]} {
    %c16_i32 = arith.constant 16 : i32
    %0 = arith.muli %arg1, %c16_i32 : i32
    %1 = tpu.assume_multiple %0, 16 : i32
    %c0 = arith.constant 0 : index
    %2 = arith.index_cast %1 : i32 to index
    %c0_0 = arith.constant 0 : index
    %c0_1 = arith.constant 0 : index
    %3 = vector.load %arg2[%c0, %2, %c0_0, %c0_1] : memref<1x18x18x4xbf16, #tpu.memory_space<vmem>>, vector<1x18x18x4xbf16>
    %4 = vector.shape_cast %3 : vector<1x18x18x4xbf16> to vector<18x18x4xbf16>
    %5 = vector.extract_strided_slice %4 {offsets = [0, 0, 0], sizes = [16, 18, 4], strides = [1, 1, 1]} : vector<18x18x4xbf16> to vector<16x18x4xbf16>
    %6 = vector.extract_strided_slice %5 {offsets = [0, 0, 0], sizes = [16, 16, 4], strides = [1, 1, 1]} : vector<16x18x4xbf16> to vector<16x16x4xbf16>
    %7 = vector.shape_cast %6 : vector<16x16x4xbf16> to vector<256x4xbf16>
    %c0_2 = arith.constant 0 : index
    %c0_3 = arith.constant 0 : index
    %c0_4 = arith.constant 0 : index
    %c0_5 = arith.constant 0 : index
    %8 = vector.load %arg3[%c0_2, %c0_3, %c0_4, %c0_5] : memref<3x3x4x128xbf16, #tpu.memory_space<vmem>>, vector<1x1x4x128xbf16>
    %9 = vector.shape_cast %8 : vector<1x1x4x128xbf16> to vector<4x128xbf16>
    %cst = arith.constant dense<0.000000e+00> : vector<256x128xf32>
    %10 = tpu.matmul %7, %9, %cst {dimension_numbers = #tpu.dot_dimension_numbers<[1], [0], [0], [1], [0, 0, 1, 1], [], []>} : vector<256x4xbf16>, vector<4x128xbf16>, vector<256x128xf32> -> vector<256x128xf32>
    %11 = vector.extract_strided_slice %5 {offsets = [0, 1, 0], sizes = [16, 16, 4], strides = [1, 1, 1]} : vector<16x18x4xbf16> to vector<16x16x4xbf16>
    %12 = vector.shape_cast %11 : vector<16x16x4xbf16> to vector<256x4xbf16>
    %c0_6 = arith.constant 0 : index
    %c1 = arith.constant 1 : index
    %c0_7 = arith.constant 0 : index
    %c0_8 = arith.constant 0 : index
    %13 = vector.load %arg3[%c0_6, %c1, %c0_7, %c0_8] : memref<3x3x4x128xbf16, #tpu.memory_space<vmem>>, vector<1x1x4x128xbf16>
    %14 = vector.shape_cast %13 : vector<1x1x4x128xbf16> to vector<4x128xbf16>
    %cst_9 = arith.constant dense<0.000000e+00> : vector<256x128xf32>
    %15 = tpu.matmul %12, %14, %cst_9 {dimension_numbers = #tpu.dot_dimension_numbers<[1], [0], [0], [1], [0, 0, 1, 1], [], []>} : vector<256x4xbf16>, vector<4x128xbf16>, vector<256x128xf32> -> vector<256x128xf32>
    %16 = arith.addf %10, %15 : vector<256x128xf32>
    %17 = vector.extract_strided_slice %5 {offsets = [0, 2, 0], sizes = [16, 16, 4], strides = [1, 1, 1]} : vector<16x18x4xbf16> to vector<16x16x4xbf16>
    %18 = vector.shape_cast %17 : vector<16x16x4xbf16> to vector<256x4xbf16>
    %c0_10 = arith.constant 0 : index
    %c2 = arith.constant 2 : index
    %c0_11 = arith.constant 0 : index
    %c0_12 = arith.constant 0 : index
    %19 = vector.load %arg3[%c0_10, %c2, %c0_11, %c0_12] : memref<3x3x4x128xbf16, #tpu.memory_space<vmem>>, vector<1x1x4x128xbf16>
    %20 = vector.shape_cast %19 : vector<1x1x4x128xbf16> to vector<4x128xbf16>
    %cst_13 = arith.constant dense<0.000000e+00> : vector<256x128xf32>
    %21 = tpu.matmul %18, %20, %cst_13 {dimension_numbers = #tpu.dot_dimension_numbers<[1], [0], [0], [1], [0, 0, 1, 1], [], []>} : vector<256x4xbf16>, vector<4x128xbf16>, vector<256x128xf32> -> vector<256x128xf32>
    %22 = arith.addf %16, %21 : vector<256x128xf32>
    %23 = vector.extract_strided_slice %4 {offsets = [1, 0, 0], sizes = [16, 18, 4], strides = [1, 1, 1]} : vector<18x18x4xbf16> to vector<16x18x4xbf16>
    %24 = vector.extract_strided_slice %23 {offsets = [0, 0, 0], sizes = [16, 16, 4], strides = [1, 1, 1]} : vector<16x18x4xbf16> to vector<16x16x4xbf16>
    %25 = vector.shape_cast %24 : vector<16x16x4xbf16> to vector<256x4xbf16>
    %c1_14 = arith.constant 1 : index
    %c0_15 = arith.constant 0 : index
    %c0_16 = arith.constant 0 : index
    %c0_17 = arith.constant 0 : index
    %26 = vector.load %arg3[%c1_14, %c0_15, %c0_16, %c0_17] : memref<3x3x4x128xbf16, #tpu.memory_space<vmem>>, vector<1x1x4x128xbf16>
    %27 = vector.shape_cast %26 : vector<1x1x4x128xbf16> to vector<4x128xbf16>
    %cst_18 = arith.constant dense<0.000000e+00> : vector<256x128xf32>
    %28 = tpu.matmul %25, %27, %cst_18 {dimension_numbers = #tpu.dot_dimension_numbers<[1], [0], [0], [1], [0, 0, 1, 1], [], []>} : vector<256x4xbf16>, vector<4x128xbf16>, vector<256x128xf32> -> vector<256x128xf32>
    %29 = arith.addf %22, %28 : vector<256x128xf32>
    %30 = vector.extract_strided_slice %23 {offsets = [0, 1, 0], sizes = [16, 16, 4], strides = [1, 1, 1]} : vector<16x18x4xbf16> to vector<16x16x4xbf16>
    %31 = vector.shape_cast %30 : vector<16x16x4xbf16> to vector<256x4xbf16>
    %c1_19 = arith.constant 1 : index
    %c1_20 = arith.constant 1 : index
    %c0_21 = arith.constant 0 : index
    %c0_22 = arith.constant 0 : index
    %32 = vector.load %arg3[%c1_19, %c1_20, %c0_21, %c0_22] : memref<3x3x4x128xbf16, #tpu.memory_space<vmem>>, vector<1x1x4x128xbf16>
    %33 = vector.shape_cast %32 : vector<1x1x4x128xbf16> to vector<4x128xbf16>
    %cst_23 = arith.constant dense<0.000000e+00> : vector<256x128xf32>
    %34 = tpu.matmul %31, %33, %cst_23 {dimension_numbers = #tpu.dot_dimension_numbers<[1], [0], [0], [1], [0, 0, 1, 1], [], []>} : vector<256x4xbf16>, vector<4x128xbf16>, vector<256x128xf32> -> vector<256x128xf32>
    %35 = arith.addf %29, %34 : vector<256x128xf32>
    %36 = vector.extract_strided_slice %23 {offsets = [0, 2, 0], sizes = [16, 16, 4], strides = [1, 1, 1]} : vector<16x18x4xbf16> to vector<16x16x4xbf16>
    %37 = vector.shape_cast %36 : vector<16x16x4xbf16> to vector<256x4xbf16>
    %c1_24 = arith.constant 1 : index
    %c2_25 = arith.constant 2 : index
    %c0_26 = arith.constant 0 : index
    %c0_27 = arith.constant 0 : index
    %38 = vector.load %arg3[%c1_24, %c2_25, %c0_26, %c0_27] : memref<3x3x4x128xbf16, #tpu.memory_space<vmem>>, vector<1x1x4x128xbf16>
    %39 = vector.shape_cast %38 : vector<1x1x4x128xbf16> to vector<4x128xbf16>
    %cst_28 = arith.constant dense<0.000000e+00> : vector<256x128xf32>
    %40 = tpu.matmul %37, %39, %cst_28 {dimension_numbers = #tpu.dot_dimension_numbers<[1], [0], [0], [1], [0, 0, 1, 1], [], []>} : vector<256x4xbf16>, vector<4x128xbf16>, vector<256x128xf32> -> vector<256x128xf32>
    %41 = arith.addf %35, %40 : vector<256x128xf32>
    %42 = vector.extract_strided_slice %4 {offsets = [2, 0, 0], sizes = [16, 18, 4], strides = [1, 1, 1]} : vector<18x18x4xbf16> to vector<16x18x4xbf16>
    %43 = vector.extract_strided_slice %42 {offsets = [0, 0, 0], sizes = [16, 16, 4], strides = [1, 1, 1]} : vector<16x18x4xbf16> to vector<16x16x4xbf16>
    %44 = vector.shape_cast %43 : vector<16x16x4xbf16> to vector<256x4xbf16>
    %c2_29 = arith.constant 2 : index
    %c0_30 = arith.constant 0 : index
    %c0_31 = arith.constant 0 : index
    %c0_32 = arith.constant 0 : index
    %45 = vector.load %arg3[%c2_29, %c0_30, %c0_31, %c0_32] : memref<3x3x4x128xbf16, #tpu.memory_space<vmem>>, vector<1x1x4x128xbf16>
    %46 = vector.shape_cast %45 : vector<1x1x4x128xbf16> to vector<4x128xbf16>
    %cst_33 = arith.constant dense<0.000000e+00> : vector<256x128xf32>
    %47 = tpu.matmul %44, %46, %cst_33 {dimension_numbers = #tpu.dot_dimension_numbers<[1], [0], [0], [1], [0, 0, 1, 1], [], []>} : vector<256x4xbf16>, vector<4x128xbf16>, vector<256x128xf32> -> vector<256x128xf32>
    %48 = arith.addf %41, %47 : vector<256x128xf32>
    %49 = vector.extract_strided_slice %42 {offsets = [0, 1, 0], sizes = [16, 16, 4], strides = [1, 1, 1]} : vector<16x18x4xbf16> to vector<16x16x4xbf16>
    %50 = vector.shape_cast %49 : vector<16x16x4xbf16> to vector<256x4xbf16>
    %c2_34 = arith.constant 2 : index
    %c1_35 = arith.constant 1 : index
    %c0_36 = arith.constant 0 : index
    %c0_37 = arith.constant 0 : index
    %51 = vector.load %arg3[%c2_34, %c1_35, %c0_36, %c0_37] : memref<3x3x4x128xbf16, #tpu.memory_space<vmem>>, vector<1x1x4x128xbf16>
    %52 = vector.shape_cast %51 : vector<1x1x4x128xbf16> to vector<4x128xbf16>
    %cst_38 = arith.constant dense<0.000000e+00> : vector<256x128xf32>
    %53 = tpu.matmul %50, %52, %cst_38 {dimension_numbers = #tpu.dot_dimension_numbers<[1], [0], [0], [1], [0, 0, 1, 1], [], []>} : vector<256x4xbf16>, vector<4x128xbf16>, vector<256x128xf32> -> vector<256x128xf32>
    %54 = arith.addf %48, %53 : vector<256x128xf32>
    %55 = vector.extract_strided_slice %42 {offsets = [0, 2, 0], sizes = [16, 16, 4], strides = [1, 1, 1]} : vector<16x18x4xbf16> to vector<16x16x4xbf16>
    %56 = vector.shape_cast %55 : vector<16x16x4xbf16> to vector<256x4xbf16>
    %c2_39 = arith.constant 2 : index
    %c2_40 = arith.constant 2 : index
    %c0_41 = arith.constant 0 : index
    %c0_42 = arith.constant 0 : index
    %57 = vector.load %arg3[%c2_39, %c2_40, %c0_41, %c0_42] : memref<3x3x4x128xbf16, #tpu.memory_space<vmem>>, vector<1x1x4x128xbf16>
    %58 = vector.shape_cast %57 : vector<1x1x4x128xbf16> to vector<4x128xbf16>
    %cst_43 = arith.constant dense<0.000000e+00> : vector<256x128xf32>
    %59 = tpu.matmul %56, %58, %cst_43 {dimension_numbers = #tpu.dot_dimension_numbers<[1], [0], [0], [1], [0, 0, 1, 1], [], []>} : vector<256x4xbf16>, vector<4x128xbf16>, vector<256x128xf32> -> vector<256x128xf32>
    %60 = arith.addf %54, %59 : vector<256x128xf32>
    %61 = vector.extract_strided_slice %60 {offsets = [0, 0], sizes = [256, 8], strides = [1, 1]} : vector<256x128xf32> to vector<256x8xf32>
    %62 = vector.shape_cast %61 : vector<256x8xf32> to vector<16x16x8xf32>
    %63 = arith.truncf %62 : vector<16x16x8xf32> to vector<16x16x8xbf16>
    %c0_44 = arith.constant 0 : index
    %c0_45 = arith.constant 0 : index
    %c0_46 = arith.constant 0 : index
    %c0_47 = arith.constant 0 : index
    %64 = vector.load %arg4[%c0_44, %c0_45, %c0_46, %c0_47] : memref<1x16x16x8xbf16, #tpu.memory_space<vmem>>, vector<1x16x16x8xbf16>
    %65 = vector.shape_cast %64 : vector<1x16x16x8xbf16> to vector<16x16x8xbf16>
    %66 = vector.shape_cast %63 : vector<16x16x8xbf16> to vector<1x16x16x8xbf16>
    tpu.vector_store %arg4[%c0_44, %c0_45, %c0_46, %c0_47], %66 {strides = array<i32>} : memref<1x16x16x8xbf16, #tpu.memory_space<vmem>>, vector<1x16x16x8xbf16>,
    %cst_48 = arith.constant dense<0.000000e+00> : vector<128xf32>
    %67 = vector.multi_reduction <add>, %60, %cst_48 [0] : vector<256x128xf32> to vector<128xf32>
    %68 = vector.shape_cast %67 : vector<128xf32> to vector<1x128xf32>
    %69 = arith.mulf %60, %60 : vector<256x128xf32>
    %cst_49 = arith.constant dense<0.000000e+00> : vector<128xf32>
    %70 = vector.multi_reduction <add>, %69, %cst_49 [0] : vector<256x128xf32> to vector<128xf32>
    %71 = vector.shape_cast %70 : vector<128xf32> to vector<1x128xf32>
    %72 = tpu.concatenate %68, %71 in 0 : vector<1x128xf32>, vector<1x128xf32> -> vector<2x128xf32>
    %c0_50 = arith.constant 0 : index
    %c0_51 = arith.constant 0 : index
    %c0_52 = arith.constant 0 : index
    %c0_53 = arith.constant 0 : index
    %73 = vector.load %arg5[%c0_50, %c0_51, %c0_52, %c0_53] : memref<1x1x2x128xf32, #tpu.memory_space<vmem>>, vector<1x1x2x128xf32>
    %74 = vector.shape_cast %73 : vector<1x1x2x128xf32> to vector<2x128xf32>
    %75 = vector.shape_cast %72 : vector<2x128xf32> to vector<1x1x2x128xf32>
    tpu.vector_store %arg5[%c0_50, %c0_51, %c0_52, %c0_53], %75 {strides = array<i32>} : memref<1x1x2x128xf32, #tpu.memory_space<vmem>>, vector<1x1x2x128xf32>,
    return
  }
  func.func @transform_0(%arg0: i32, %arg1: i32) -> (i32, i32, i32, i32) {
    %c0_i32 = arith.constant 0 : i32
    %c0_i32_0 = arith.constant 0 : i32
    %c0_i32_1 = arith.constant 0 : i32
    %c0_i32_2 = arith.constant 0 : i32
    return %arg0, %c0_i32, %c0_i32_0, %c0_i32_1 : i32, i32, i32, i32
  }
  func.func @transform_1(%arg0: i32, %arg1: i32) -> (i32, i32, i32, i32) {
    %c0_i32 = arith.constant 0 : i32
    %c0_i32_0 = arith.constant 0 : i32
    %c0_i32_1 = arith.constant 0 : i32
    %c0_i32_2 = arith.constant 0 : i32
    %c0_i32_3 = arith.constant 0 : i32
    return %c0_i32, %c0_i32_0, %c0_i32_1, %c0_i32_2 : i32, i32, i32, i32
  }
  func.func @transform_2(%arg0: i32, %arg1: i32) -> (i32, i32, i32, i32) {
    %c0_i32 = arith.constant 0 : i32
    %c0_i32_0 = arith.constant 0 : i32
    %c0_i32_1 = arith.constant 0 : i32
    return %arg0, %arg1, %c0_i32, %c0_i32_0 : i32, i32, i32, i32
  }
  func.func @transform_3(%arg0: i32, %arg1: i32) -> (i32, i32, i32, i32) {
    %c0_i32 = arith.constant 0 : i32
    %c0_i32_0 = arith.constant 0 : i32
    %c0_i32_1 = arith.constant 0 : i32
    return %arg0, %arg1, %c0_i32, %c0_i32_0 : i32, i32, i32, i32
  }
}

</mosaic_0001>

<bundles_post_ra>
// kernel: tpu_custom_call.1
= control target key start
LH: loop header
LB: loop body
LE: loop exit
PB: predicated region body
PF: predicated region fallthrough
CT: control target
= control target key end

     0   :  { %9 = vsyncpa [#allocation3], 0  ;;  %s5703_s0 = inlined_call_operand.vmem [shape: bf16[2,18,18,4], index: 0, kind: input, shape index: {}]   ;;  %s5704_s1 = inlined_call_operand.vmem [shape: bf16[3,3,4,128], index: 1, kind: input, shape index: {}]   ;;  %s5705_s2 = inlined_call_operand.vmem [shape: bf16[2,16,16,8], index: 2, kind: output, shape index: {0}]   ;;  %s5706_s3 = inlined_call_operand.hbm [shape: f32[2,1,2,128], index: 3, kind: output, shape index: {1}]  }
   0x1   :  { %11 = vsyncpa [#allocation3 + $0x1], 0  ;;  %s4548_s12 = smov 0   ;;  %s4550_s13 = smov 0  }
   0x2   :  { %s4552_s14 = smov 0   ;;  %s4554_s15 = smov 0  }
   0x3   :  { %s4556_s16 = smov 0   ;;  %s4558_s17 = smov 0  }
   0x4 LB: > { %s3340_s18 = sadd.s32 4294967295, %s4525_s17   ;;  %s3341_s19 = sadd.s32 4294967294, %s4525_s17   ;;  %s4525_s17 = sphi %s4558_s17, %s17_s17   ;;  %s4521_s16 = sphi %s4556_s16, %s5790_s16   ;;  %s4517_s15 = sphi %s4554_s15, %s5789_s15   ;;  %s4513_s14 = sphi %s4552_s14, %s5788_s14   ;;  %s4509_s13 = sphi %s4550_s13, %s5787_s13   ;;  %s4505_s12 = sphi %s4548_s12, %s5786_s12  }
   0x5   : > { %s29_s20 = sadd.s32 1, %s4521_s16  ;;  %s113_s21 = sadd.s32 1, %s4513_s14 }
   0x6   : > { %p31_p0 = scmp.ge.s32.totalorder %s29_s20, 2  ;;  %p123_p1 = scmp.ne.s32.totalorder %s4513_s14, %s4509_s13 }
   0x7   : > { %p124_p2 = scmp.eq.s32.totalorder %s3340_s18, 1  ;;  %p129_p3 = scmp.ne.s32.totalorder %s4509_s13, %s4505_s12 }
   0x8   : > { %s5792_s20 = smov (%p31_p0, %s29_s20), 0  ;;  %p130_p5 = scmp.eq.s32.totalorder %s3341_s19, 1 }
   0x9   : > { %p4588_p4 = por %p124_p2, %p123_p1  ;;  %s108_s23 = ssub.s32 %s4521_s16, %s5792_s20 }
   0xa   : > { %p3344_p6 = scmp.ge.s32.totalorder %s4525_s17, 1  ;;  %p111_p7 = scmp.eq.s32.totalorder %s108_s23, 0 }
   0xb   : > { %p4595_p8 = por %p130_p5, %p129_p3  ;;  %p159_p9 = scmp.lt.s32.totalorder %s4525_s17, 3 }
   0xc   : > { %s4601_s25 = scalar_select %p111_p7, %s4513_s14, %s113_s21  }
   0xd   : > { %p160_p10 = pnand %p3344_p6, %p159_p9 }
   0xf   : > { %163 = sbr.rel (%p160_p10) target bundleno = 594 (0x252), region = 28 }
  0x16   : > { %v3349_v0 = vld [vmem:[%s5704_s1 + $0x2] sm:$0x3]  ;;  %vm755_vm0 = vcmask 1041408   ;;  %v3481_v1 = vld [vmem:[%s5704_s1 + $0x8] sm:$0x3]  ;;  %p193_p11 = scmp.lt.s32.totalorder %s4517_s15, 1 }
  0x17   : > { %4359 = vmatprep.subr.msk.bf16.mxu1 %vm755_vm0, %v3349_v0  ;;  %4363 = vmatprep.subr.msk.bf16.mxu0 %vm755_vm0, %v3481_v1  ;;  %v757_v2 = vsel %vm755_vm0, %v3349_v0, 0  ;;  %v4614_v3 = vsel %vm755_vm0, %v3481_v1, 0  ;;  %v268_v4 = vld [vmem:[%s5704_s1] sm:$0x3]  ;;  %v3500_v5 = vld [vmem:[%s5704_s1 + $0xa] sm:$0x3] }
  0x18   : > { %5740 = vst [vmem:[#allocation5_spill] sm:$0xff] %v4614_v3  ;;  %3796 = vmatpush3.bf16.msra.mxu1 %v757_v2  ;;  %3932 = vmatpush3.bf16.msra.mxu0 %v4614_v3  ;;  %s4618_s30 = scalar_select %p193_p11, %s4517_s15, 1  ;;  %vm269_vm1 = vsmask.f32 3328  ;;  %vm270_vm2 = vsmask.f32 7440 }
  0x19   : > { %4360 = vmatprep.subr.msk.bf16.mxu1 %vm755_vm0, %v268_v4  ;;  %4365 = vmatprep.subr.msk.bf16.mxu0 %vm755_vm0, %v3500_v5  ;;  %v4635_v6 = vsel %vm755_vm0, %v268_v4, 0  ;;  %v4638_v7 = vsel %vm755_vm0, %v3500_v5, 0  ;;  %v4643_v8 = vld [vmem:[%s5704_s1 + $0xc] sm:$0x3]  ;;  %vm706_vm3 = vcmask 31744   ;;  %vm4679_vm4 = vmor %vm269_vm1, %vm270_vm2  ;;  %vm1228_vm5 = vcmask 1042432  }
  0x1a   : > { %s4369_s8 = smul.u32 216, %s4618_s30  ;;  %v4667_v20 = vsel %vm755_vm0, %v4643_v8, 0  ;;  %vm1229_vm6 = vcmask 1046532   ;;  %vm3057_vm8 = vcmask 60416   ;;  %s3606_s19 = sshll.u32 %s4517_s15, 5  ;;  %vm3196_vm9 = vcmask 1040384  }
  0x1b   : > { %vm4860_vm7 = vmor %vm1228_vm5, %vm1229_vm6  ;;  %s5656_s28 = scalar_lea.hbm %s5706_s3, %s3606_s19  ;;  %s4527_s15 = smov [#allocation2]  }
  0x1c   : > { %s4632_s11 = scalar_lea.vmem %s5703_s0, %s4369_s8  ;;  %s3609_s8 = sshll.u32 %s4618_s30, 7 }
  0x1d   : > { %v4646_v9 = vld [vmem:[%s4632_s11] sm:$0xf]  ;;  %v4649_v10 = vld [vmem:[%s4632_s11 + $0x4] sm:$0xf]  ;;  %v216_v11 = vld [vmem:[%s4632_s11 + $0x8] sm:$0x1] }
  0x1e   : > { %v273_v12 = vshrl.u32 %v4646_v9, 16  ;;  %v276_v13 = vshll.u32 %v4646_v9, 16  ;;  %v282_v14 = vshll.u32 %v4649_v10, 16  ;;  %v286_v15 = vshrl.u32 %v4649_v10, 16  ;;  %v4657_v16 = vld [vmem:[%s4632_s11 + $0xc] sm:$0xf] }
  0x1f   : > { %v292_v17 = vshll.u32 %v216_v11, 16  ;;  %v4660_v18 = vld [vmem:[%s4632_s11 + $0x10] sm:$0xf]  ;;  %v4663_v19 = vld [vmem:[%s4632_s11 + $0x14] sm:$0x1]  ;;  %v297_v26 = vshrl.u32 %v4657_v16, 16 }
  0x20   : > { %v275_v21 = vrot.slane %v273_v12, 4  ;;  %v278_v22 = vrot.slane %v276_v13, 5  ;;  %v284_v23 = vrot.slane %v282_v14, 5  ;;  %v288_v24 = vrot.slane %v286_v15, 4  ;;  %v4675_v33 = vld [vmem:[%s4632_s11 + $0x18] sm:$0xf] }
  0x21   : > { %v294_v25 = vrot.slane %v292_v17, 5  ;;  %v300_v27 = vshll.u32 %v4657_v16, 16  ;;  %v306_v28 = vshll.u32 %v4660_v18, 16  ;;  %v310_v31 = vshrl.u32 %v4660_v18, 16  ;;  %v4688_v39 = vld [vmem:[%s4632_s11 + $0x1c] sm:$0xf] }
  0x22   : > { %v279_v29 = vor.u32 %v278_v22, %v275_v21  ;;  %v289_v30 = vor.u32 %v288_v24, %v284_v23  ;;  %v316_v32 = vshll.u32 %v4663_v19, 16  ;;  %v299_v35 = vrot.slane %v297_v26, 4  ;;  %v4692_v46 = vld [vmem:[%s4632_s11 + $0x20] sm:$0x1]  ;;  %v4702_v57 = vld [vmem:[%s4632_s11 + $0x24] sm:$0xf] }
  0x23   : > { %v302_v36 = vrot.slane %v300_v27, 5  ;;  %v308_v37 = vrot.slane %v306_v28, 5  ;;  %v4685_v38 = vcombine.low %v4657_v16, %v4660_v18  ;;  %v312_v42 = vrot.slane %v310_v31, 4  ;;  %v4707_v62 = vld [vmem:[%s4632_s11 + $0x28] sm:$0xf]  ;;  %s190_s30 = sand.u32 1, %s4509_s13  }
  0x24   : > { %v280_v40 = vrot.slane %v279_v29, 4  ;;  %v290_v41 = vrot.slane %v289_v30, 4  ;;  %v318_v43 = vrot.slane %v316_v32, 5  ;;  %v1243_v45 = vrot.slane %v4663_v19, 5  ;;  %v4715_v4 = vld [vmem:[%s4632_s11 + $0x2c] sm:$0x1] }
  0x25   : > { %v303_v44 = vor.u32 %v302_v36, %v299_v35  ;;  %v321_v47 = vshrl.u32 %v4675_v33, 16  ;;  %v324_v48 = vshll.u32 %v4675_v33, 16  ;;  %v313_v51 = vor.u32 %v312_v42, %v308_v37  ;;  %v4721_v14 = vld [vmem:[%s4632_s11 + $0x30] sm:$0xf]  ;;  %v4733_v28 = vld [vmem:[%s4632_s11 + $0x34] sm:$0xf] }
  0x26   : > { %v285_v49 = vsel %vm4679_vm4, %v280_v40, %v284_v23  ;;  %v295_v50 = vsel %vm4679_vm4, %v290_v41, %v294_v25  ;;  %v330_v52 = vshll.u32 %v4688_v39, 16  ;;  %v334_v60 = vshrl.u32 %v4688_v39, 16  ;;  %v4728_v23 = vld [vmem:[%s5704_s1 + $0x4] sm:$0x3]  ;;  %v4740_v32 = vld [vmem:[%s4632_s11 + $0x38] sm:$0x1] }
  0x27   : > { %v3350_v53 = vcombine.low %v285_v49, %v295_v50  ;;  %v304_v54 = vrot.slane %v303_v44, 4  ;;  %v323_v55 = vrot.slane %v321_v47, 4  ;;  %v326_v56 = vrot.slane %v324_v48, 5  ;;  %v4748_v48 = vld [vmem:[%s4632_s11 + $0x3c] sm:$0xf]  ;;  %s3345_s18 = sshll.u32 %s190_s30, 1 }
  0x28   : > { %v314_v58 = vrot.slane %v313_v51, 4  ;;  %v332_v59 = vrot.slane %v330_v52, 5  ;;  %v340_v61 = vshll.u32 %v4692_v46, 16  ;;  %v1247_v1 = vrot.slane %v4688_v39, 5  ;;  %v4756_v52 = vld [vmem:[%s4632_s11 + $0x40] sm:$0xf] }
  0x29   : > { %3797 = vmatprep.mubr.msk.bf16.mxu1 %vm706_vm3, %v3350_v53  ;;  %v309_v63 = vsel %vm4679_vm4, %v304_v54, %v308_v37  ;;  %v327_v0 = vor.u32 %v326_v56, %v323_v55  ;;  %v1250_v2 = vrot.slane %v4692_v46, 5  ;;  %v336_v11 = vrot.slane %v334_v60, 4  ;;  %s192_s21 = scalar_lea.vmem [#allocation2], %s3345_s18  ;;  %s3210_s29 = scalar_lea.sflag [#allocation3], %s190_s30 }
  0x2a   : > { %v319_v5 = vsel %vm4679_vm4, %v314_v58, %v318_v43  ;;  %v342_v12 = vrot.slane %v340_v61, 5  ;;  %v345_v13 = vshrl.u32 %v4702_v57, 16  ;;  %v348_v21 = vshll.u32 %v4702_v57, 16  ;;  %s3228_s23 = sshll.u32 %s192_s21, 4  ;;  %s4451_s5 = sshll.u32 %s4527_s15, 4  ;;  %s5658_s23 = int_to_ptr.vmem [resolvable:$true] %s3228_s23  ;;  %s4452_s5 = int_to_ptr.vmem [resolvable:$false] %s4451_s5 }
  0x2b   : > { %v3351_v15 = vcombine.low %v309_v63, %v319_v5  ;;  %v328_v17 = vrot.slane %v327_v0, 4  ;;  %v354_v22 = vshll.u32 %v4707_v62, 16  ;;  %v337_v24 = vor.u32 %v336_v11, %v332_v59  ;;  %v4768_v5 = vld [vmem:[%s4632_s11 + $0x44] sm:$0x1]  ;;  %s4447_s4 = scalar_lea.vmem %s5658_s23, 32  ;;  %s4453_s6 = scalar_lea.vmem %s4452_s5, 64 }
  0x2c   : > { %v347_v25 = vrot.slane %v345_v13, 4  ;;  %v358_v26 = vshrl.u32 %v4707_v62, 16  ;;  %v364_v27 = vshll.u32 %v4715_v4, 16  ;;  %v350_v30 = vrot.slane %v348_v21, 5  ;;  %v4773_v13 = vld [vmem:[%s4632_s11 + $0x48] sm:$0xf]  ;;  %p4448_p12 = scmp.ne.s32.totalorder %s5658_s23, %s4447_s4  ;;  %p4454_p1 = scmp.lt.s32.totalorder %s5658_s23, %s4452_s5 }
  0x2d   : > { %3933 = vmatprep.mubr.msk.bf16.mxu0 %vm706_vm3, %v3351_v15  ;;  %3798 = vmatmul.mubr.msk.bf16.vlgmr.msra.gmra.mrb[0].mxu1 %vm706_vm3, %v3351_v15  ;;  %v333_v29 = vsel %vm4679_vm4, %v328_v17, %v332_v59  ;;  %v356_v31 = vrot.slane %v354_v22, 5  ;;  %v369_v35 = vshrl.u32 %v4721_v14, 16  ;;  %v338_v36 = vrot.slane %v337_v24, 4  ;;  %v4780_v24 = vld [vmem:[%s4632_s11 + $0x4c] sm:$0xf]  ;;  %p4455_p2 = scmp.lt.s32.totalorder %s4453_s6, %s4447_s4 }
  0x2e   : > { %3830 = vmatpush3.bf16.msra.mxu1 %v4635_v6  ;;  %v360_v37 = vrot.slane %v358_v26, 4  ;;  %v366_v40 = vrot.slane %v364_v27, 5  ;;  %v372_v41 = vshll.u32 %v4721_v14, 16  ;;  %v351_v42 = vor.u32 %v350_v30, %v347_v25  ;;  %p4449_p13 = pnand %p4448_p12, %p4588_p4 }
  0x2f   : > { %v371_v43 = vrot.slane %v369_v35, 4  ;;  %v378_v44 = vshll.u32 %v4733_v28, 16  ;;  %v382_v47 = vshrl.u32 %v4733_v28, 16  ;;  %4361 = vmatprep.subr.msk.bf16.mxu1 %vm755_vm0, %v4728_v23  ;;  %v343_v49 = vsel %vm4679_vm4, %v338_v36, %v342_v12  ;;  %p4456_p3 = por %p4455_p2, %p4454_p1 }
  0x30   : > { %v361_v6 = vor.u32 %v360_v37, %v356_v31  ;;  %v374_v50 = vrot.slane %v372_v41, 5  ;;  %v388_v51 = vshll.u32 %v4740_v32, 16  ;;  %v4758_v53 = vcombine.low %v333_v29, %v343_v49  ;;  %p4450_p0 = pneg %p4449_p13 }
  0x31   : > { %v352_v54 = vrot.slane %v351_v42, 4  ;;  %v380_v55 = vrot.slane %v378_v44, 5  ;;  %v384_v56 = vrot.slane %v382_v47, 4  ;;  %v393_v61 = vshrl.u32 %v4748_v48, 16  ;;  %v4802_v42 = vld [vmem:[%s4632_s11 + $0x54] sm:$0xf] }
  0x32   : > { %5743 = vst [vmem:[#allocation6_spill] sm:$0xff] %v4758_v53  ;;  %v362_v58 = vrot.slane %v361_v6, 4  ;;  %v375_v59 = vor.u32 %v374_v50, %v371_v43  ;;  %v390_v60 = vrot.slane %v388_v51, 5  ;;  %3934 = vmatmul.mubr.msk.bf16.vlgmr.msra.gmra.mrb[0].mxu0 %vm706_vm3, %v4758_v53  ;;  %3801 = vmatprep.mubr.msk.bf16.mxu1 %vm706_vm3, %v4758_v53  ;;  %v396_v11 = vshll.u32 %v4748_v48, 16  ;;  %5745 = vst [vmem:[#allocation8_spill] sm:$0xff] %v4802_v42  ;;  %p4457_p5 = pnand %p4456_p3, %p4450_p0 }
  0x33   : > { %v357_v63 = vsel %vm4679_vm4, %v352_v54, %v356_v31  ;;  %v385_v0 = vor.u32 %v384_v56, %v380_v55  ;;  %v402_v12 = vshll.u32 %v4756_v52, 16  ;;  %3966 = vmatpush3.bf16.msra.mxu0 %v4638_v7  ;;  %v395_v21 = vrot.slane %v393_v61, 4  ;;  %v4807_v6 = vld [vmem:[%s4632_s11 + $0x58] sm:$0xf] }
  0x34   : > { %v367_v15 = vsel %vm4679_vm4, %v362_v58, %v366_v40  ;;  %v376_v17 = vrot.slane %v375_v59, 4  ;;  %v406_v22 = vshrl.u32 %v4756_v52, 16  ;;  %v398_v27 = vrot.slane %v396_v11, 5  ;;  %4366 = vmatprep.subr.msk.bf16.mxu0 %vm755_vm0, %v4643_v8  ;;  %v4797_v8 = vld [vmem:[%s4632_s11 + $0x50] sm:$0x1] }
  0x35   : > { %v4782_v25 = vcombine.low %v357_v63, %v367_v15  ;;  %v386_v26 = vrot.slane %v385_v0, 4  ;;  %v404_v29 = vrot.slane %v402_v12, 5  ;;  %v412_v31 = vshll.u32 %v4768_v5, 16  ;;  %v4820_v11 = vld [vmem:[%s4632_s11 + $0x5c] sm:$0x1] }
  0x36   : > { %v381_v7 = vsel %vm4679_vm4, %v376_v17, %v380_v55  ;;  %v408_v30 = vrot.slane %v406_v22, 4  ;;  %v417_v35 = vshrl.u32 %v4773_v13, 16  ;;  %v399_v37 = vor.u32 %v398_v27, %v395_v21  ;;  %v4824_v15 = vld [vmem:[%s4632_s11 + $0x60] sm:$0xf]  ;;  %v4829_v27 = vld [vmem:[%s4632_s11 + $0x64] sm:$0xf] }
  0x37   : > { %5744 = vst [vmem:[#allocation7_spill] sm:$0xff] %v4782_v25  ;;  %3937 = vmatprep.mubr.msk.bf16.mxu0 %vm706_vm3, %v4782_v25  ;;  %3802 = vmatmul.mubr.msk.bf16.gmra.mrb[4].mxu1 %vm706_vm3, %v4782_v25  ;;  %v391_v36 = vsel %vm4679_vm4, %v386_v26, %v390_v60  ;;  %v420_v40 = vshll.u32 %v4773_v13, 16  ;;  %v426_v41 = vshll.u32 %v4780_v24, 16  ;;  %v414_v47 = vrot.slane %v412_v31, 5  ;;  %v5041_v25 = vld [vmem:[%s4632_s11 + $0xa8] sm:$0xf] }
  0x38   : > { %v4804_v43 = vcombine.low %v381_v7, %v391_v36  ;;  %v409_v44 = vor.u32 %v408_v30, %v404_v29  ;;  %v419_v49 = vrot.slane %v417_v35, 4  ;;  %v400_v50 = vrot.slane %v399_v37, 4 }
  0x39   : > { %v422_v51 = vrot.slane %v420_v40, 5  ;;  %v428_v54 = vrot.slane %v426_v41, 5  ;;  %v430_v55 = vshrl.u32 %v4780_v24, 16  ;;  %v436_v58 = vshll.u32 %v4797_v8, 16 }
  0x3a   : > { %5746 = vst [vmem:[#allocation9_spill] sm:$0xff] %v4804_v43  ;;  %3805 = vmatprep.mubr.msk.bf16.mxu1 %vm706_vm3, %v4804_v43  ;;  %v410_v56 = vrot.slane %v409_v44, 4  ;;  %v441_v59 = vshrl.u32 %v4802_v42, 16  ;;  %v444_v60 = vshll.u32 %v4802_v42, 16  ;;  %3938 = vmatmul.mubr.msk.bf16.gmra.mrb[4].mxu0 %vm706_vm3, %v4804_v43  ;;  %v405_v61 = vsel %vm4679_vm4, %v400_v50, %v404_v29 }
  0x3b   : > { %v423_v63 = vor.u32 %v422_v51, %v419_v49  ;;  %v432_v0 = vrot.slane %v430_v55, 4  ;;  %v450_v12 = vshll.u32 %v4807_v6, 16  ;;  %v438_v21 = vrot.slane %v436_v58, 5 }
  0x3c   : > { %v415_v17 = vsel %vm4679_vm4, %v410_v56, %v414_v47  ;;  %v443_v22 = vrot.slane %v441_v59, 4  ;;  %v446_v26 = vrot.slane %v444_v60, 5  ;;  %v454_v36 = vshrl.u32 %v4807_v6, 16  ;;  %v4843_v47 = vld [vmem:[%s4632_s11 + $0x68] sm:$0x1] }
  0x3d   : > { %v4831_v7 = vcombine.low %v405_v61, %v415_v17  ;;  %v424_v29 = vrot.slane %v423_v63, 4  ;;  %v433_v30 = vor.u32 %v432_v0, %v428_v54  ;;  %v452_v31 = vrot.slane %v450_v12, 5 }
  0x3e   : > { %v447_v35 = vor.u32 %v446_v26, %v443_v22  ;;  %v460_v37 = vshll.u32 %v4820_v11, 16  ;;  %v465_v40 = vshrl.u32 %v4824_v15, 16  ;;  %v468_v49 = vshll.u32 %v4824_v15, 16 }
  0x3f   : > { %5747 = vst [vmem:[#allocation10_spill] sm:$0xff] %v4831_v7  ;;  %3941 = vmatprep.mubr.msk.bf16.mxu0 %vm706_vm3, %v4831_v7  ;;  %3806 = vmatmul.mubr.msk.bf16.gmra.mrb[8].mxu1 %vm706_vm3, %v4831_v7  ;;  %v429_v41 = vsel %vm4679_vm4, %v424_v29, %v428_v54  ;;  %v434_v44 = vrot.slane %v433_v30, 4  ;;  %v474_v50 = vshll.u32 %v4829_v27, 16  ;;  %v456_v55 = vrot.slane %v454_v36, 4  ;;  %v4851_v54 = vld [vmem:[%s4632_s11 + $0x6c] sm:$0xf] }
  0x40   : > { %v448_v51 = vrot.slane %v447_v35, 4  ;;  %v462_v56 = vrot.slane %v460_v37, 5  ;;  %v467_v58 = vrot.slane %v465_v40, 4  ;;  %v470_v60 = vrot.slane %v468_v49, 5  ;;  %v4867_v36 = vld [vmem:[%s4632_s11 + $0x70] sm:$0xf] }
  0x41   : > { %v439_v59 = vsel %vm4679_vm4, %v434_v44, %v438_v21  ;;  %v476_v61 = vrot.slane %v474_v50, 5  ;;  %v478_v63 = vshrl.u32 %v4829_v27, 16  ;;  %v457_v17 = vor.u32 %v456_v55, %v452_v31  ;;  %v5018_v7 = vld [vmem:[%s4632_s11 + $0xa0] sm:$0xf] }
  0x42   : > { %v4853_v0 = vcombine.low %v429_v41, %v439_v59  ;;  %v453_v12 = vsel %vm4679_vm4, %v448_v51, %v452_v31  ;;  %v484_v22 = vshll.u32 %v4843_v47, 16  ;;  %v471_v21 = vor.u32 %v470_v60, %v467_v58  ;;  %v4880_v51 = vld [vmem:[%s4632_s11 + $0x74] sm:$0x1] }
  0x43   : > { %v480_v29 = vrot.slane %v478_v63, 4  ;;  %v3415_v30 = vrot.slane %v4657_v16, 9  ;;  %v1240_v35 = vrot.slane %v4660_v18, 5  ;;  %v458_v31 = vrot.slane %v457_v17, 4 }
  0x44   : > { %5748 = vst [vmem:[#allocation11_spill] sm:$0xff] %v4853_v0  ;;  %3942 = vmatmul.mubr.msk.bf16.gmra.mrb[8].mxu0 %vm706_vm3, %v4853_v0  ;;  %3809 = vmatprep.mubr.msk.bf16.mxu1 %vm706_vm3, %v4853_v0  ;;  %v486_v37 = vrot.slane %v484_v22, 5  ;;  %v489_v40 = vshrl.u32 %v4851_v54, 16  ;;  %v492_v41 = vshll.u32 %v4851_v54, 16  ;;  %v472_v44 = vrot.slane %v471_v21, 4 }
  0x45   : > { %v481_v49 = vor.u32 %v480_v29, %v476_v61  ;;  %v1241_v16 = vsel %vm4860_vm7, %v3415_v30, %v1240_v35  ;;  %v1242_v18 = vrot.slane %v1240_v35, 4  ;;  %v463_v50 = vsel %vm4679_vm4, %v458_v31, %v462_v56  ;;  %v4892_v56 = vld [vmem:[%s4632_s11 + $0x78] sm:$0xf]  ;;  %v4908_v31 = vld [vmem:[%s4632_s11 + $0x7c] sm:$0xf] }
  0x46   : > { %v491_v55 = vrot.slane %v489_v40, 4  ;;  %v494_v58 = vrot.slane %v492_v41, 5  ;;  %v498_v59 = vshll.u32 %v4867_v36, 16  ;;  %v4883_v60 = vcombine.low %v453_v12, %v463_v50 }
  0x47   : > { %v477_v63 = vsel %vm4679_vm4, %v472_v44, %v476_v61  ;;  %v482_v17 = vrot.slane %v481_v49, 4  ;;  %v1244_v22 = vsel %vm4860_vm7, %v1242_v18, %v1243_v45  ;;  %v502_v35 = vshrl.u32 %v4867_v36, 16  ;;  %v4913_v49 = vld [vmem:[%s4632_s11 + $0x80] sm:$0x1] }
  0x48   : > { %5751 = vst [vmem:[#allocation12_spill] sm:$0xff] %v4883_v60  ;;  %v4894_v21 = vcombine.low %v1241_v16, %v1244_v22  ;;  %v495_v29 = vor.u32 %v494_v58, %v491_v55  ;;  %v500_v30 = vrot.slane %v498_v59, 5  ;;  %3945 = vmatprep.mubr.msk.bf16.mxu0 %vm706_vm3, %v4883_v60  ;;  %3810 = vmatmul.mubr.msk.bf16.gmra.mrb[12].mxu1 %vm706_vm3, %v4883_v60  ;;  %v508_v45 = vshll.u32 %v4880_v51, 16  ;;  %v5011_v60 = vld [vmem:[%s4632_s11 + $0x9c] sm:$0xf] }
  0x49   : > { %v487_v19 = vsel %vm4679_vm4, %v482_v17, %v486_v37  ;;  %v3416_v61 = vrot.slane %v4675_v33, 9  ;;  %v1249_v12 = vrot.slane %v1247_v1, 4  ;;  %v504_v44 = vrot.slane %v502_v35, 4 }
  0x4a   : > { %5752 = vst [vmem:[#allocation13_spill] sm:$0xff] %v4894_v21  ;;  %v4910_v40 = vcombine.low %v477_v63, %v487_v19  ;;  %v496_v41 = vrot.slane %v495_v29, 4  ;;  %v513_v16 = vshrl.u32 %v4892_v56, 16  ;;  %v510_v18 = vrot.slane %v508_v45, 5  ;;  %v4939_v29 = vld [vmem:[%s4632_s11 + $0x84] sm:$0xf] }
  0x4b   : > { %v1248_v37 = vsel %vm4860_vm7, %v3416_v61, %v1247_v1  ;;  %v1251_v50 = vsel %vm4860_vm7, %v1249_v12, %v1250_v2  ;;  %v516_v55 = vshll.u32 %v4892_v56, 16  ;;  %v505_v59 = vor.u32 %v504_v44, %v500_v30 }
  0x4c   : > { %5753 = vst [vmem:[#allocation14_spill] sm:$0xff] %v4910_v40  ;;  %3946 = vmatmul.mubr.msk.bf16.gmra.mrb[12].mxu0 %vm706_vm3, %v4910_v40  ;;  %3813 = vmatprep.mubr.msk.bf16.mxu1 %vm706_vm3, %v4910_v40  ;;  %v501_v58 = vsel %vm4679_vm4, %v496_v41, %v500_v30  ;;  %v4931_v63 = vcombine.low %v1248_v37, %v1251_v50  ;;  %v515_v1 = vrot.slane %v513_v16, 4  ;;  %v522_v2 = vshll.u32 %v4908_v31, 16  ;;  %v4945_v16 = vld [vmem:[%s4632_s11 + $0x88] sm:$0xf] }
  0x4d   : > { %3967 = vmatprep.mubr.msk.bf16.mxu0 %vm706_vm3, %v4894_v21  ;;  %v518_v46 = vrot.slane %v516_v55, 5  ;;  %v526_v17 = vshrl.u32 %v4908_v31, 16  ;;  %v532_v22 = vshll.u32 %v4913_v49, 16  ;;  %v506_v35 = vrot.slane %v505_v59, 4 }
  0x4e   : > { %5754 = vst [vmem:[#allocation15_spill] sm:$0xff] %v4931_v63  ;;  %v3417_v30 = vrot.slane %v4702_v57, 9  ;;  %v1254_v19 = vrot.slane %v4707_v62, 5  ;;  %v1257_v45 = vrot.slane %v4715_v4, 5  ;;  %v524_v12 = vrot.slane %v522_v2, 5 }
  0x4f   : > { %v519_v61 = vor.u32 %v518_v46, %v515_v1  ;;  %v528_v41 = vrot.slane %v526_v17, 4  ;;  %v534_v44 = vrot.slane %v532_v22, 5  ;;  %v511_v37 = vsel %vm4679_vm4, %v506_v35, %v510_v18  ;;  %v4955_v1 = vld [vmem:[%s4632_s11 + $0x8c] sm:$0x1] }
  0x50   : > { %v1255_v50 = vsel %vm4860_vm7, %v3417_v30, %v1254_v19  ;;  %v1256_v55 = vrot.slane %v1254_v19, 4  ;;  %v537_v59 = vshrl.u32 %v4939_v29, 16  ;;  %v4952_v3 = vcombine.low %v501_v58, %v511_v37 }
  0x51   : > { %v520_v40 = vrot.slane %v519_v61, 4  ;;  %v529_v4 = vor.u32 %v528_v41, %v524_v12  ;;  %v540_v46 = vshll.u32 %v4939_v29, 16  ;;  %v546_v18 = vshll.u32 %v4945_v16, 16  ;;  %v4969_v61 = vld [vmem:[%s4632_s11 + $0x90] sm:$0xf] }
  0x52   : > { %5755 = vst [vmem:[#allocation16_spill] sm:$0xff] %v4952_v3  ;;  %v1258_v2 = vsel %vm4860_vm7, %v1256_v55, %v1257_v45  ;;  %v539_v17 = vrot.slane %v537_v59, 4  ;;  %v550_v22 = vshrl.u32 %v4945_v16, 16  ;;  %3814 = vmatmul.mubr.msk.bf16.gmra.mrb[16].mxu1 %vm706_vm3, %v4952_v3  ;;  %v4974_v45 = vld [vmem:[%s5704_s1 + $0xe] sm:$0x3]  ;;  %v1261_v59 = vrot.slane %v4733_v28, 5 }
  0x53   : > { %v525_v58 = vsel %vm4679_vm4, %v520_v40, %v524_v12  ;;  %v530_v35 = vrot.slane %v529_v4, 4  ;;  %v4966_v30 = vcombine.low %v1255_v50, %v1258_v2  ;;  %v542_v19 = vrot.slane %v540_v46, 5  ;;  %5757 = vst [vmem:[#allocation18_spill] sm:$0xff] %v4974_v45  ;;  %v4988_v46 = vld [vmem:[%s4632_s11 + $0x94] sm:$0xf] }
  0x54   : > { %3968 = vmatmul.mubr.msk.bf16.vlgmr.msra.gmra.mrb[0].mxu0 %vm706_vm3, %v4931_v63  ;;  %v548_v41 = vrot.slane %v546_v18, 5  ;;  %v552_v37 = vrot.slane %v550_v22, 4  ;;  %v556_v40 = vshll.u32 %v4955_v1, 16  ;;  %v3418_v12 = vrot.slane %v4721_v14, 9  ;;  %v4993_v3 = vld [vmem:[%s4632_s11 + $0x98] sm:$0x1] }
  0x55   : > { %5756 = vst [vmem:[#allocation17_spill] sm:$0xff] %v4966_v30  ;;  %4000 = vmatpush3.bf16.msra.mxu0 %v4667_v20  ;;  %v535_v50 = vsel %vm4679_vm4, %v530_v35, %v534_v44  ;;  %3971 = vmatprep.mubr.msk.bf16.mxu0 %vm706_vm3, %v4966_v30  ;;  %v543_v55 = vor.u32 %v542_v19, %v539_v17  ;;  %v1264_v4 = vrot.slane %v4740_v32, 5  ;;  %v561_v20 = vshrl.u32 %v4969_v61, 16 }
  0x56   : > { %v4990_v2 = vcombine.low %v525_v58, %v535_v50  ;;  %v553_v18 = vor.u32 %v552_v37, %v548_v41  ;;  %v558_v22 = vrot.slane %v556_v40, 5  ;;  %4367 = vmatprep.subr.msk.bf16.mxu0 %vm755_vm0, %v4974_v45  ;;  %v1262_v17 = vsel %vm4860_vm7, %v3418_v12, %v1261_v59 }
  0x57   : > { %v544_v44 = vrot.slane %v543_v55, 4  ;;  %v1263_v35 = vrot.slane %v1261_v59, 4  ;;  %v564_v32 = vshll.u32 %v4969_v61, 16  ;;  %v563_v19 = vrot.slane %v561_v20, 4 }
  0x58   : > { %5758 = vst [vmem:[#allocation19_spill] sm:$0xff] %v4990_v2  ;;  %3817 = vmatprep.mubr.msk.bf16.mxu1 %vm706_vm3, %v4990_v2  ;;  %v554_v58 = vrot.slane %v553_v18, 4  ;;  %v570_v37 = vshll.u32 %v4988_v46, 16  ;;  %v574_v40 = vshrl.u32 %v4988_v46, 16  ;;  %v580_v59 = vshll.u32 %v4993_v3, 16 }
  0x59   : > { %v549_v50 = vsel %vm4679_vm4, %v544_v44, %v548_v41  ;;  %v1265_v55 = vsel %vm4860_vm7, %v1263_v35, %v1264_v4  ;;  %v566_v12 = vrot.slane %v564_v32, 5  ;;  %v3419_v4 = vrot.slane %v4748_v48, 9 }
  0x5a   : > { %v559_v2 = vsel %vm4679_vm4, %v554_v58, %v558_v22  ;;  %v5015_v18 = vcombine.low %v1262_v17, %v1265_v55  ;;  %v572_v20 = vrot.slane %v570_v37, 5  ;;  %v576_v0 = vrot.slane %v574_v40, 4  ;;  %v5031_v58 = vld [vmem:[%s4632_s11 + $0xa4] sm:$0x1] }
  0x5b   : > { %v5020_v43 = vcombine.low %v549_v50, %v559_v2  ;;  %v567_v41 = vor.u32 %v566_v12, %v563_v19  ;;  %v582_v44 = vrot.slane %v580_v59, 5  ;;  %v1268_v32 = vrot.slane %v4756_v52, 5 }
  0x5c   : > { %5759 = vst [vmem:[#allocation20_spill] sm:$0xff] %v5015_v18  ;;  %3972 = vmatmul.mubr.msk.bf16.gmra.mrb[4].mxu0 %vm706_vm3, %v5015_v18  ;;  %v577_v35 = vor.u32 %v576_v0, %v572_v20  ;;  %v1271_v22 = vrot.slane %v4768_v5, 5  ;;  %v585_v17 = vshrl.u32 %v5011_v60, 16  ;;  %v588_v19 = vshll.u32 %v5011_v60, 16 }
  0x5d   : > { %5760 = vst [vmem:[#allocation21_spill] sm:$0xff] %v5020_v43  ;;  %3818 = vmatmul.mubr.msk.bf16.gmra.mrb[20].mxu1 %vm706_vm3, %v5020_v43  ;;  %v568_v2 = vrot.slane %v567_v41, 4  ;;  %v594_v37 = vshll.u32 %v5018_v7, 16  ;;  %v598_v0 = vshrl.u32 %v5018_v7, 16  ;;  %v1269_v5 = vsel %vm4860_vm7, %v3419_v4, %v1268_v32 }
  0x5e   : > { %v578_v40 = vrot.slane %v577_v35, 4  ;;  %v1270_v50 = vrot.slane %v1268_v32, 4  ;;  %v587_v55 = vrot.slane %v585_v17, 4  ;;  %v590_v59 = vrot.slane %v588_v19, 5  ;;  %v5050_v32 = vld [vmem:[%s4632_s11 + $0xac] sm:$0xf] }
  0x5f   : > { %v573_v12 = vsel %vm4679_vm4, %v568_v2, %v572_v20  ;;  %v596_v41 = vrot.slane %v594_v37, 5  ;;  %v600_v43 = vrot.slane %v598_v0, 4  ;;  %v604_v35 = vshll.u32 %v5031_v58, 16 }
  0x60   : > { %v583_v53 = vsel %vm4679_vm4, %v578_v40, %v582_v44  ;;  %v1272_v18 = vsel %vm4860_vm7, %v1270_v50, %v1271_v22  ;;  %v3420_v4 = vrot.slane %v4773_v13, 9  ;;  %v591_v2 = vor.u32 %v590_v59, %v587_v55 }
  0x61   : > { %v5052_v17 = vcombine.low %v573_v12, %v583_v53  ;;  %v5054_v20 = vcombine.low %v1269_v5, %v1272_v18  ;;  %v601_v19 = vor.u32 %v600_v43, %v596_v41  ;;  %v606_v37 = vrot.slane %v604_v35, 5  ;;  %v5064_v18 = vld [vmem:[%s4632_s11 + $0xb0] sm:$0x1] }
  0x62   : > { %v1275_v0 = vrot.slane %v4780_v24, 5  ;;  %v1278_v44 = vrot.slane %v4797_v8, 5  ;;  %v609_v22 = vshrl.u32 %v5041_v25, 16  ;;  %v592_v53 = vrot.slane %v591_v2, 4 }
  0x63   : > { %5761 = vst [vmem:[#allocation22_spill] sm:$0xff] %v5052_v17  ;;  %5762 = vst [vmem:[#allocation23_spill] sm:$0xff] %v5054_v20  ;;  %3821 = vmatprep.mubr.msk.bf16.mxu1 %vm706_vm3, %v5052_v17  ;;  %3975 = vmatprep.mubr.msk.bf16.mxu0 %vm706_vm3, %v5054_v20  ;;  %v602_v40 = vrot.slane %v601_v19, 4  ;;  %v612_v43 = vshll.u32 %v5041_v25, 16  ;;  %v618_v5 = vshll.u32 %v5050_v32, 16  ;;  %v622_v12 = vshrl.u32 %v5050_v32, 16 }
  0x64   : > { %v1276_v8 = vsel %vm4860_vm7, %v3420_v4, %v1275_v0  ;;  %v1277_v50 = vrot.slane %v1275_v0, 4  ;;  %v611_v55 = vrot.slane %v609_v22, 4  ;;  %v597_v59 = vsel %vm4679_vm4, %v592_v53, %v596_v41  ;;  %v5076_v17 = vld [vmem:[%s4632_s11 + $0xb4] sm:$0xf]  ;;  %v5088_v53 = vld [vmem:[%s4632_s11 + $0xb8] sm:$0xf] }
  0x65   : > { %v607_v35 = vsel %vm4679_vm4, %v602_v40, %v606_v37  ;;  %v614_v2 = vrot.slane %v612_v43, 5  ;;  %v620_v19 = vrot.slane %v618_v5, 5  ;;  %v624_v0 = vrot.slane %v622_v12, 4 }
  0x66   : > { %v5078_v20 = vcombine.low %v597_v59, %v607_v35  ;;  %v1279_v4 = vsel %vm4860_vm7, %v1277_v50, %v1278_v44  ;;  %v628_v22 = vshll.u32 %v5064_v18, 16  ;;  %v3421_v41 = vrot.slane %v4802_v42, 9  ;;  %v5094_v44 = vld [vmem:[%s4632_s11 + $0xbc] sm:$0x1] }
  0x67   : > { %v5083_v30 = vcombine.low %v1276_v8, %v1279_v4  ;;  %v615_v63 = vor.u32 %v614_v2, %v611_v55  ;;  %v1282_v37 = vrot.slane %v4807_v6, 5  ;;  %v625_v40 = vor.u32 %v624_v0, %v620_v19 }
  0x68   : > { %5763 = vst [vmem:[#allocation24_spill] sm:$0xff] %v5078_v20  ;;  %3822 = vmatmul.mubr.msk.bf16.gmra.mrb[24].mxu1 %vm706_vm3, %v5078_v20  ;;  %v630_v43 = vrot.slane %v628_v22, 5  ;;  %v1285_v5 = vrot.slane %v4820_v11, 5  ;;  %v633_v50 = vshrl.u32 %v5076_v17, 16  ;;  %v636_v59 = vshll.u32 %v5076_v17, 16 }
  0x69   : > { %5764 = vst [vmem:[#allocation25_spill] sm:$0xff] %v5083_v30  ;;  %3976 = vmatmul.mubr.msk.bf16.gmra.mrb[8].mxu0 %vm706_vm3, %v5083_v30  ;;  %v616_v8 = vrot.slane %v615_v63, 4  ;;  %v1283_v55 = vsel %vm4860_vm7, %v3421_v41, %v1282_v37  ;;  %v1284_v12 = vrot.slane %v1282_v37, 4  ;;  %v626_v35 = vrot.slane %v625_v40, 4 }
  0x6a   : > { %v635_v2 = vrot.slane %v633_v50, 4  ;;  %v642_v4 = vshll.u32 %v5088_v53, 16  ;;  %v646_v11 = vshrl.u32 %v5088_v53, 16  ;;  %v638_v20 = vrot.slane %v636_v59, 5 }
  0x6b   : > { %v621_v0 = vsel %vm4679_vm4, %v616_v8, %v620_v19  ;;  %v1286_v22 = vsel %vm4860_vm7, %v1284_v12, %v1285_v5  ;;  %v652_v63 = vshll.u32 %v5094_v44, 16  ;;  %v631_v41 = vsel %vm4679_vm4, %v626_v35, %v630_v43 }
  0x6c   : > { %v5111_v37 = vcombine.low %v1283_v55, %v1286_v22  ;;  %v644_v40 = vrot.slane %v642_v4, 5  ;;  %v648_v50 = vrot.slane %v646_v11, 4  ;;  %v5113_v30 = vcombine.low %v621_v0, %v631_v41 }
  0x6d   : > { %v639_v21 = vor.u32 %v638_v20, %v635_v2  ;;  %v654_v45 = vrot.slane %v652_v63, 5  ;;  %v3422_v42 = vrot.slane %v4824_v15, 9  ;;  %v1289_v5 = vrot.slane %v4829_v27, 5 }
  0x6e   : > { %3979 = vmatprep.mubr.msk.bf16.mxu0 %vm706_vm3, %v5111_v37  ;;  %v649_v19 = vor.u32 %v648_v50, %v644_v40  ;;  %v1292_v8 = vrot.slane %v4843_v47, 5  ;;  %v3423_v43 = vrot.slane %v4851_v54, 9  ;;  %3825 = vmatprep.mubr.msk.bf16.mxu1 %vm706_vm3, %v5113_v30  ;;  %v3382_v20 = vcombine.low %v4646_v9, %v4649_v10 }
  0x6f   : > { %v640_v55 = vrot.slane %v639_v21, 4  ;;  %v1296_v12 = vrot.slane %v4867_v36, 5  ;;  %v1299_v59 = vrot.slane %v4880_v51, 5  ;;  %v1290_v2 = vsel %vm4860_vm7, %v3422_v42, %v1289_v5 }
  0x70   : > { %v650_v35 = vrot.slane %v649_v19, 4  ;;  %v1291_v4 = vrot.slane %v1289_v5, 4  ;;  %v1303_v47 = vrot.slane %v4908_v31, 5  ;;  %v3424_v9 = vrot.slane %v4892_v56, 9 }
  0x71   : > { %v645_v11 = vsel %vm4679_vm4, %v640_v55, %v644_v40  ;;  %v1297_v21 = vsel %vm4860_vm7, %v3423_v43, %v1296_v12  ;;  %v1298_v0 = vrot.slane %v1296_v12, 4  ;;  %v1306_v42 = vrot.slane %v4913_v49, 5 }
  0x72   : > { %v655_v10 = vsel %vm4679_vm4, %v650_v35, %v654_v45  ;;  %v1293_v51 = vsel %vm4860_vm7, %v1291_v4, %v1292_v8  ;;  %v1305_v22 = vrot.slane %v1303_v47, 4  ;;  %v3425_v19 = vrot.slane %v4939_v29, 9 }
  0x73   : > { %v5140_v63 = vcombine.low %v645_v11, %v655_v10  ;;  %v5142_v41 = vcombine.low %v1290_v2, %v1293_v51  ;;  %v1300_v40 = vsel %vm4860_vm7, %v1298_v0, %v1299_v59  ;;  %v1310_v5 = vrot.slane %v4945_v16, 5 }
  0x74   : > { %v5146_v50 = vcombine.low %v1297_v21, %v1300_v40  ;;  %v1313_v49 = vrot.slane %v4955_v1, 5  ;;  %v1304_v45 = vsel %vm4860_vm7, %v3424_v9, %v1303_v47  ;;  %v1307_v8 = vsel %vm4860_vm7, %v1305_v22, %v1306_v42 }
  0x75   : > { %3826 = vmatmul.mubr.msk.bf16.gmra.mrb[28].mxu1 %vm706_vm3, %v5140_v63  ;;  %3980 = vmatmul.mubr.msk.bf16.gmra.mrb[12].mxu0 %vm706_vm3, %v5142_v41  ;;  %v1312_v43 = vrot.slane %v1310_v5, 4  ;;  %v1317_v55 = vrot.slane %v4988_v46, 5  ;;  %v1324_v12 = vrot.slane %v5018_v7, 5  ;;  %v1311_v59 = vsel %vm4860_vm7, %v3425_v19, %v1310_v5 }
  0x76   : > { %3831 = vmatprep.mubr.msk.bf16.mxu1 %vm706_vm3, %v3382_v20  ;;  %3983 = vmatprep.mubr.msk.bf16.mxu0 %vm706_vm3, %v5146_v50  ;;  %v5168_v20 = vcombine.low %v1304_v45, %v1307_v8  ;;  %v3426_v35 = vrot.slane %v4969_v61, 9  ;;  %v1320_v4 = vrot.slane %v4993_v3, 5  ;;  %v5174_v47 = vcombine.low %v4675_v33, %v4688_v39  ;;  %v5186_v3 = vld [vmem:[%s5704_s1 + $0x6] sm:$0x3] }
  0x77   : > { %v1314_v1 = vsel %vm4860_vm7, %v1312_v43, %v1313_v49  ;;  %v1319_v2 = vrot.slane %v1317_v55, 4  ;;  %v3427_v11 = vrot.slane %v5011_v60, 9  ;;  %v1442_v21 = vsel %vm755_vm0, %v4728_v23, 0 }
  0x78   : > { %v5179_v0 = vcombine.low %v1311_v59, %v1314_v1  ;;  %v1326_v9 = vrot.slane %v1324_v12, 4  ;;  %v1327_v10 = vrot.slane %v5031_v58, 5  ;;  %v1331_v51 = vrot.slane %v5050_v32, 5 }
  0x79   : > { %v1318_v33 = vsel %vm4860_vm7, %v3426_v35, %v1317_v55  ;;  %v1321_v39 = vsel %vm4860_vm7, %v1319_v2, %v1320_v4  ;;  %v5200_v23 = vcombine.low %v4702_v57, %v4707_v62  ;;  %v1325_v58 = vsel %vm4860_vm7, %v3427_v11, %v1324_v12 }
  0x7a   : > { %v5206_v22 = vcombine.low %v4824_v15, %v4829_v27  ;;  %v1328_v42 = vsel %vm4860_vm7, %v1326_v9, %v1327_v10  ;;  %v3428_v40 = vrot.slane %v5041_v25, 9  ;;  %v1338_v19 = vrot.slane %v5088_v53, 5 }
  0x7b   : > { %v5216_v57 = vcombine.low %v4851_v54, %v4867_v36  ;;  %v5220_v62 = vcombine.low %v1318_v33, %v1321_v39  ;;  %v1333_v15 = vrot.slane %v1331_v51, 4  ;;  %v1334_v27 = vrot.slane %v5064_v18, 5  ;;  %v264_v18 = vld [vmem:[%s4632_s11 + $0xc8] sm:$0x1] }
  0x7c   : > { %v5225_v5 = vcombine.low %v4892_v56, %v4908_v31  ;;  %v5229_v49 = vcombine.low %v4939_v29, %v4945_v16  ;;  %v5233_v54 = vcombine.low %v4969_v61, %v4988_v46  ;;  %v5237_v36 = vcombine.low %v5011_v60, %v5018_v7  ;;  %v5256_v61 = vld [vmem:[%s4632_s11 + $0xc4] sm:$0xf] }
  0x7d   : > { %3832 = vmatmul.mubr.msk.bf16.vlgmr.msra.gmra.mrb[0].mxu1 %vm706_vm3, %v4685_v38  ;;  %3984 = vmatmul.mubr.msk.bf16.gmra.mrb[16].mxu0 %vm706_vm3, %v5168_v20  ;;  %v5241_v45 = vcombine.low %v5041_v25, %v5050_v32  ;;  %v5245_v56 = vcombine.low %v4721_v14, %v4733_v28  ;;  %v5247_v31 = vcombine.low %v1325_v58, %v1328_v42  ;;  %v3429_v16 = vrot.slane %v5076_v17, 9  ;;  %v5765_v42 = vld [vmem:[#allocation8_spill] sm:$0xff] }
  0x7e   : > { %3864 = vmatpush3.bf16.msra.mxu1 %v1442_v21  ;;  %3835 = vmatprep.mubr.msk.bf16.mxu1 %vm706_vm3, %v5174_v47  ;;  %v5251_v29 = vcombine.low %v5076_v17, %v5088_v53  ;;  %v1340_v7 = vrot.slane %v1338_v19, 4  ;;  %v1341_v60 = vrot.slane %v5094_v44, 5  ;;  %v1332_v14 = vsel %vm4860_vm7, %v3428_v40, %v1331_v51  ;;  %v5276_v17 = vld [vmem:[%s4632_s11 + $0xc0] sm:$0xf] }
  0x7f   : > { %3987 = vmatprep.mubr.msk.bf16.mxu0 %vm706_vm3, %v5179_v0  ;;  %4362 = vmatprep.subr.msk.bf16.mxu1 %vm755_vm0, %v5186_v3  ;;  %v1335_v28 = vsel %vm4860_vm7, %v1333_v15, %v1334_v27  ;;  %v2074_v25 = vrot.slane %v5256_v61, 5  ;;  %v1339_v46 = vsel %vm4860_vm7, %v3429_v16, %v1338_v19  ;;  %v5281_v53 = vcombine.low %v4748_v48, %v4756_v52 }
  0x80   : > { %v1342_v32 = vsel %vm4860_vm7, %v1340_v7, %v1341_v60  ;;  %v5283_v44 = vcombine.low %v1332_v14, %v1335_v28  ;;  %v5287_v8 = vcombine.low %v4773_v13, %v4780_v24  ;;  %v1844_v43 = vshrl.u32 %v5276_v17, 16  ;;  %v3555_v60 = vld [vmem:[%s5704_s1 + $0x10] sm:$0x3]  ;;  %v4443_v14 = vld [vmem:[%s4632_s11 + $0x4] sm:$0xf] }
  0x81   : > { %v1847_v55 = vshll.u32 %v5276_v17, 16  ;;  %v1853_v12 = vshll.u32 %v5256_v61, 16  ;;  %v1857_v59 = vshrl.u32 %v5256_v61, 16  ;;  %v5293_v1 = vcombine.low %v1339_v46, %v1342_v32  ;;  %v4445_v32 = vld [vmem:[%s4632_s11] sm:$0xf] }
  0x82   : > { %v3499_v35 = vrot.slane %v5276_v17, 9  ;;  %v2076_v48 = vrot.slane %v2074_v25, 4  ;;  %v2077_v52 = vrot.slane %v264_v18, 5  ;;  %v1846_v2 = vrot.slane %v1844_v43, 4 }
  0x83   : > { %v1849_v4 = vrot.slane %v1847_v55, 5  ;;  %v1855_v11 = vrot.slane %v1853_v12, 5  ;;  %v1859_v21 = vrot.slane %v1857_v59, 4  ;;  %v1863_v9 = vshll.u32 %v264_v18, 16 }
  0x84   : > { %v2075_v10 = vsel %vm4860_vm7, %v3499_v35, %v2074_v25  ;;  %v2078_v51 = vsel %vm4860_vm7, %v2076_v48, %v2077_v52  ;;  %v5310_v40 = vcombine.low %v5765_v42, %v4807_v6  ;;  %v5766_v6 = vld [vmem:[#allocation18_spill] sm:$0xff]  ;;  %v1233_v28 = vrot.slane %v4443_v14, 5  ;;  %v4444_v25 = vld [vmem:[%s4632_s11 + $0x8] sm:$0x1]  ;;  %v5768_v52 = vld [vmem:[#allocation15_spill] sm:$0xff] }
  0x85   : > { %3836 = vmatmul.mubr.msk.bf16.gmra.mrb[4].mxu1 %vm706_vm3, %v5200_v23  ;;  %3988 = vmatmul.mubr.msk.bf16.gmra.mrb[20].mxu0 %vm706_vm3, %v5220_v62  ;;  %v1850_v13 = vor.u32 %v1849_v4, %v1846_v2  ;;  %v1860_v24 = vor.u32 %v1859_v21, %v1855_v11  ;;  %v1865_v58 = vrot.slane %v1863_v9, 5  ;;  %v5312_v19 = vcombine.low %v2075_v10, %v2078_v51  ;;  %v5767_v48 = vld [vmem:[#allocation13_spill] sm:$0xff]  ;;  %v5770_v4 = vld [vmem:[#allocation20_spill] sm:$0xff]  ;;  %v5771_v21 = vld [vmem:[#allocation23_spill] sm:$0xff] }
  0x86   : > { %3839 = vmatprep.mubr.msk.bf16.mxu1 %vm706_vm3, %v5245_v56  ;;  %3991 = vmatprep.mubr.msk.bf16.mxu0 %vm706_vm3, %v5247_v31  ;;  %v2522_v7 = vsel %vm755_vm0, %v5766_v6, 0  ;;  %v1236_v46 = vrot.slane %v4444_v25, 5  ;;  %v3414_v18 = vrot.slane %v4445_v32, 9  ;;  %v1235_v43 = vrot.slane %v1233_v28, 4  ;;  %v4446_v2 = vld [vmem:[%s5704_s1 + $0x8] sm:$0x3] }
  0x87   : > { %v1851_v33 = vrot.slane %v1850_v13, 4  ;;  %v1861_v39 = vrot.slane %v1860_v24, 4  ;;  %v1648_v35 = vsel %vm755_vm0, %v5186_v3, 0  ;;  %v5769_v3 = vld [vmem:[#allocation17_spill] sm:$0xff]  ;;  %v5407_v24 = vld [vmem:[%s4632_s11 + $0xcc] sm:$0xf] }
  0x88   : > { %v1234_v55 = vsel %vm4860_vm7, %v3414_v18, %v1233_v28  ;;  %v1237_v12 = vsel %vm4860_vm7, %v1235_v43, %v1236_v46  ;;  %v5772_v13 = vld [vmem:[#allocation25_spill] sm:$0xff]  ;;  %v5410_v9 = vld [vmem:[%s4632_s11 + $0xd0] sm:$0xf]  ;;  %v2734_v10 = vsel %vm755_vm0, %v3555_v60, 0  ;;  %v5774_v51 = vld [vmem:[#allocation7_spill] sm:$0xff]  ;;  %v2493_v14 = vshll.u32 %v5407_v24, 16 }
  0x89   : > { %v1856_v15 = vsel %vm4679_vm4, %v1851_v33, %v1855_v11  ;;  %v1866_v27 = vsel %vm4679_vm4, %v1861_v39, %v1865_v58  ;;  %v3431_v59 = vcombine.low %v1234_v55, %v1237_v12  ;;  %v5396_v11 = vcombine.low %v5276_v17, %v5256_v61  ;;  %v5773_v17 = vld [vmem:[#allocation6_spill] sm:$0xff]  ;;  %v5775_v33 = vld [vmem:[#allocation9_spill] sm:$0xff]  ;;  %v5777_v58 = vld [vmem:[#allocation11_spill] sm:$0xff] }
  0x8a   : > { %v5318_v16 = vcombine.low %v1856_v15, %v1866_v27  ;;  %v3519_v61 = vcombine.low %v5407_v24, %v5410_v9  ;;  %v5776_v39 = vld [vmem:[#allocation10_spill] sm:$0xff]  ;;  %v5778_v42 = vld [vmem:[#allocation12_spill] sm:$0xff]  ;;  %v5781_v6 = vld [vmem:[#allocation19_spill] sm:$0xff]  ;;  %v2503_v28 = vshrl.u32 %v5410_v9, 16  ;;  %v2495_v32 = vrot.slane %v2493_v14, 5 }
  0x8b   : > { %v5779_v15 = vld [vmem:[#allocation14_spill] sm:$0xff]  ;;  %v5780_v27 = vld [vmem:[#allocation16_spill] sm:$0xff]  ;;  %v5783_v25 = vld [vmem:[#allocation5_spill] sm:$0xff]  ;;  %v2720_v34 = vrot.slane %v5410_v9, 5 }
  0x8c   : > { %v5784_v46 = vld [vmem:[#allocation22_spill] sm:$0xff]  ;;  %v2505_v43 = vrot.slane %v2503_v28, 4  ;;  %v267_v55 = vld [vmem:[%s4632_s11 + $0xd4] sm:$0x1]  ;;  %v5785_v12 = vld [vmem:[#allocation24_spill] sm:$0xff]  ;;  %s5578_s11 = scalar_lea.vmem %s5705_s2, %s3609_s8 }
  0x8d   : > { %3840 = vmatmul.mubr.msk.bf16.gmra.mrb[8].mxu1 %vm706_vm3, %v5281_v53  ;;  %3992 = vmatmul.mubr.msk.bf16.gmra.mrb[24].mxu0 %vm706_vm3, %v5283_v44 }
  0x8e   : > { %3843 = vmatprep.mubr.msk.bf16.mxu1 %vm706_vm3, %v5287_v8  ;;  %3995 = vmatprep.mubr.msk.bf16.mxu0 %vm706_vm3, %v5293_v1 }
  0x95   : > { %3844 = vmatmul.mubr.msk.bf16.gmra.mrb[12].mxu1 %vm706_vm3, %v5310_v40  ;;  %3996 = vmatmul.mubr.msk.bf16.gmra.mrb[28].mxu0 %vm706_vm3, %v5312_v19 }
  0x96   : > { %3847 = vmatprep.mubr.msk.bf16.mxu1 %vm706_vm3, %v5206_v22  ;;  %4001 = vmatprep.mubr.msk.bf16.mxu0 %vm706_vm3, %v5174_v47 }
  0x9d   : > { %3848 = vmatmul.mubr.msk.bf16.gmra.mrb[16].mxu1 %vm706_vm3, %v5216_v57  ;;  %4002 = vmatmul.mubr.msk.bf16.vlgmr.msra.gmra.mrb[0].mxu0 %vm706_vm3, %v5200_v23 }
  0x9e   : > { %4034 = vmatpush3.bf16.msra.mxu0 %v2522_v7  ;;  %3851 = vmatprep.mubr.msk.bf16.mxu1 %vm706_vm3, %v5225_v5  ;;  %v5782_v7 = vld [vmem:[#allocation21_spill] sm:$0xff] }
  0x9f   : > { %4005 = vmatprep.mubr.msk.bf16.mxu0 %vm706_vm3, %v5245_v56  ;;  %4368 = vmatprep.subr.msk.bf16.mxu0 %vm755_vm0, %v3555_v60  ;;  %v2490_v60 = vshrl.u32 %v5407_v24, 16 }
  0xa5   : > { %3852 = vmatmul.mubr.msk.bf16.gmra.mrb[20].mxu1 %vm706_vm3, %v5229_v49  ;;  %4006 = vmatmul.mubr.msk.bf16.gmra.mrb[4].mxu0 %vm706_vm3, %v5281_v53 }
  0xa6   : > { %3855 = vmatprep.mubr.msk.bf16.mxu1 %vm706_vm3, %v5233_v54  ;;  %4009 = vmatprep.mubr.msk.bf16.mxu0 %vm706_vm3, %v5287_v8 }
  0xad   : > { %3856 = vmatmul.mubr.msk.bf16.gmra.mrb[24].mxu1 %vm706_vm3, %v5237_v36  ;;  %4010 = vmatmul.mubr.msk.bf16.gmra.mrb[8].mxu0 %vm706_vm3, %v5310_v40 }
  0xae   : > { %3859 = vmatprep.mubr.msk.bf16.mxu1 %vm706_vm3, %v5241_v45  ;;  %4013 = vmatprep.mubr.msk.bf16.mxu0 %vm706_vm3, %v5206_v22 }
  0xb5   : > { %3860 = vmatmul.mubr.msk.bf16.gmra.mrb[28].mxu1 %vm706_vm3, %v5251_v29  ;;  %4014 = vmatmul.mubr.msk.bf16.gmra.mrb[12].mxu0 %vm706_vm3, %v5216_v57 }
  0xb6   : > { %3865 = vmatprep.mubr.msk.bf16.mxu1 %vm706_vm3, %v3431_v59  ;;  %4017 = vmatprep.mubr.msk.bf16.mxu0 %vm706_vm3, %v5225_v5 }
  0xbd   : > { %3866 = vmatmul.mubr.msk.bf16.vlgmr.msra.gmra.mrb[0].mxu1 %vm706_vm3, %v5767_v48  ;;  %4018 = vmatmul.mubr.msk.bf16.gmra.mrb[16].mxu0 %vm706_vm3, %v5229_v49 }
  0xbe   : > { %3898 = vmatpush3.bf16.msra.mxu1 %v1648_v35  ;;  %3869 = vmatprep.mubr.msk.bf16.mxu1 %vm706_vm3, %v5768_v52  ;;  %v2509_v35 = vshll.u32 %v267_v55, 16 }
  0xbf   : > { %4021 = vmatprep.mubr.msk.bf16.mxu0 %vm706_vm3, %v5233_v54  ;;  %4364 = vmatprep.subr.msk.bf16.mxu1 %vm755_vm0, %v4446_v2 }
  0xc5   : > { %3870 = vmatmul.mubr.msk.bf16.gmra.mrb[4].mxu1 %vm706_vm3, %v5769_v3  ;;  %4022 = vmatmul.mubr.msk.bf16.gmra.mrb[20].mxu0 %vm706_vm3, %v5237_v36 }
  0xc6   : > { %3873 = vmatprep.mubr.msk.bf16.mxu1 %vm706_vm3, %v5770_v4  ;;  %4025 = vmatprep.mubr.msk.bf16.mxu0 %vm706_vm3, %v5241_v45 }
  0xcd   : > { %3874 = vmatmul.mubr.msk.bf16.gmra.mrb[8].mxu1 %vm706_vm3, %v5771_v21  ;;  %4026 = vmatmul.mubr.msk.bf16.gmra.mrb[24].mxu0 %vm706_vm3, %v5251_v29 }
  0xce   : > { %3877 = vmatprep.mubr.msk.bf16.mxu1 %vm706_vm3, %v5772_v13  ;;  %4029 = vmatprep.mubr.msk.bf16.mxu0 %vm706_vm3, %v5396_v11 }
  0xd5   : > { %3878 = vmatmul.mubr.msk.bf16.gmra.mrb[12].mxu1 %vm706_vm3, %v5111_v37  ;;  %4030 = vmatmul.mubr.msk.bf16.gmra.mrb[28].mxu0 %vm706_vm3, %v3519_v61  ;;  %v2511_v61 = vrot.slane %v2509_v35, 5 }
  0xd6   : > { %3881 = vmatprep.mubr.msk.bf16.mxu1 %vm706_vm3, %v5142_v41  ;;  %4035 = vmatprep.mubr.msk.bf16.mxu0 %vm706_vm3, %v5773_v17 }
  0xdd   : > { %3882 = vmatmul.mubr.msk.bf16.gmra.mrb[16].mxu1 %vm706_vm3, %v5146_v50  ;;  %4036 = vmatmul.mubr.msk.bf16.vlgmr.msra.gmra.mrb[0].mxu0 %vm706_vm3, %v5774_v51 }
  0xde   : > { %4068 = vmatpush3.bf16.msra.mxu0 %v2734_v10  ;;  %3885 = vmatprep.mubr.msk.bf16.mxu1 %vm706_vm3, %v5168_v20 }
  0xdf   : > { %4039 = vmatprep.mubr.msk.bf16.mxu0 %vm706_vm3, %v5775_v33 }
  0xe5   : > { %3886 = vmatmul.mubr.msk.bf16.gmra.mrb[20].mxu1 %vm706_vm3, %v5179_v0  ;;  %4040 = vmatmul.mubr.msk.bf16.gmra.mrb[4].mxu0 %vm706_vm3, %v5776_v39 }
  0xe6   : > { %3889 = vmatprep.mubr.msk.bf16.mxu1 %vm706_vm3, %v5220_v62  ;;  %4043 = vmatprep.mubr.msk.bf16.mxu0 %vm706_vm3, %v5777_v58 }
  0xed   : > { %3890 = vmatmul.mubr.msk.bf16.gmra.mrb[24].mxu1 %vm706_vm3, %v5247_v31  ;;  %4044 = vmatmul.mubr.msk.bf16.gmra.mrb[8].mxu0 %vm706_vm3, %v5778_v42 }
  0xee   : > { %3893 = vmatprep.mubr.msk.bf16.mxu1 %vm706_vm3, %v5283_v44  ;;  %4047 = vmatprep.mubr.msk.bf16.mxu0 %vm706_vm3, %v5779_v15 }
  0xf5   : > { %3894 = vmatmul.mubr.msk.bf16.gmra.mrb[28].mxu1 %vm706_vm3, %v5293_v1  ;;  %4048 = vmatmul.mubr.msk.bf16.gmra.mrb[12].mxu0 %vm706_vm3, %v5780_v27 }
  0xf6   : > { %3899 = vmatprep.mubr.msk.bf16.mxu1 %vm706_vm3, %v4685_v38  ;;  %4051 = vmatprep.mubr.msk.bf16.mxu0 %vm706_vm3, %v5781_v6  ;;  %v2499_v38 = vshll.u32 %v5410_v9, 16 }
  0xf8   : > { %v2501_v18 = vrot.slane %v2499_v38, 5 }
  0xfa   : > { %v2506_v59 = vor.u32 %v2505_v43, %v2501_v18 }
  0xfc   : > { %v2507_v2 = vrot.slane %v2506_v59, 4 }
  0xfd   : > { %3900 = vmatmul.mubr.msk.bf16.vlgmr.msra.gmra.mrb[0].mxu1 %vm706_vm3, %v5174_v47  ;;  %4052 = vmatmul.mubr.msk.bf16.gmra.mrb[16].mxu0 %vm706_vm3, %v5782_v7  ;;  %v2492_v47 = vrot.slane %v2490_v60, 4 }
  0xfe   : > { %4102 = vmatpush3.bf16.msra.mxu1 %v5783_v25  ;;  %3903 = vmatprep.mubr.msk.bf16.mxu1 %vm706_vm3, %v5200_v23 }
  0xff   : > { %4055 = vmatprep.mubr.msk.bf16.mxu0 %vm706_vm3, %v5784_v46  ;;  %v2496_v23 = vor.u32 %v2495_v32, %v2492_v47 }
 0x101   : > { %v2497_v48 = vrot.slane %v2496_v23, 4 }
 0x105   : > { %3904 = vmatmul.mubr.msk.bf16.gmra.mrb[4].mxu1 %vm706_vm3, %v5245_v56  ;;  %4056 = vmatmul.mubr.msk.bf16.gmra.mrb[20].mxu0 %vm706_vm3, %v5785_v12  ;;  %v2502_v56 = vsel %vm4679_vm4, %v2497_v48, %v2501_v18 }
 0x106   : > { %3907 = vmatprep.mubr.msk.bf16.mxu1 %vm706_vm3, %v5281_v53  ;;  %4059 = vmatprep.mubr.msk.bf16.mxu0 %vm706_vm3, %v5113_v30  ;;  %v2512_v53 = vsel %vm4679_vm4, %v2507_v2, %v2511_v61 }
 0x107   : > { %v3537_v17 = vcombine.low %v2502_v56, %v2512_v53 }
 0x10d   : > { %3908 = vmatmul.mubr.msk.bf16.gmra.mrb[8].mxu1 %vm706_vm3, %v5287_v8  ;;  %4060 = vmatmul.mubr.msk.bf16.gmra.mrb[24].mxu0 %vm706_vm3, %v5140_v63 }
 0x10e   : > { %3911 = vmatprep.mubr.msk.bf16.mxu1 %vm706_vm3, %v5310_v40  ;;  %4063 = vmatprep.mubr.msk.bf16.mxu0 %vm706_vm3, %v5318_v16 }
 0x115   : > { %3912 = vmatmul.mubr.msk.bf16.gmra.mrb[12].mxu1 %vm706_vm3, %v5206_v22  ;;  %4064 = vmatmul.mubr.msk.bf16.gmra.mrb[28].mxu0 %vm706_vm3, %v3537_v17 }
 0x116   : > { %3915 = vmatprep.mubr.msk.bf16.mxu1 %vm706_vm3, %v5216_v57  ;;  %4069 = vmatprep.mubr.msk.bf16.mxu0 %vm706_vm3, %v5768_v52 }
 0x11d   : > { %3916 = vmatmul.mubr.msk.bf16.gmra.mrb[16].mxu1 %vm706_vm3, %v5225_v5  ;;  %4070 = vmatmul.mubr.msk.bf16.vlgmr.msra.gmra.mrb[0].mxu0 %vm706_vm3, %v5769_v3 }
 0x11e   : > { %3919 = vmatprep.mubr.msk.bf16.mxu1 %vm706_vm3, %v5229_v49  ;;  %4073 = vmatprep.mubr.msk.bf16.mxu0 %vm706_vm3, %v5770_v4 }
 0x125   : > { %3920 = vmatmul.mubr.msk.bf16.gmra.mrb[20].mxu1 %vm706_vm3, %v5233_v54  ;;  %4074 = vmatmul.mubr.msk.bf16.gmra.mrb[4].mxu0 %vm706_vm3, %v5771_v21 }
 0x126   : > { %3923 = vmatprep.mubr.msk.bf16.mxu1 %vm706_vm3, %v5237_v36  ;;  %4077 = vmatprep.mubr.msk.bf16.mxu0 %vm706_vm3, %v5772_v13 }
 0x12d   : > { %3924 = vmatmul.mubr.msk.bf16.gmra.mrb[24].mxu1 %vm706_vm3, %v5241_v45  ;;  %4078 = vmatmul.mubr.msk.bf16.gmra.mrb[8].mxu0 %vm706_vm3, %v5111_v37  ;;  %v3554_v37 = vrot.slane %v5407_v24, 9 }
 0x12e   : > { %3927 = vmatprep.mubr.msk.bf16.mxu1 %vm706_vm3, %v5251_v29  ;;  %4081 = vmatprep.mubr.msk.bf16.mxu0 %vm706_vm3, %v5142_v41  ;;  %v2722_v41 = vrot.slane %v2720_v34, 4 }
 0x135   : > { %3928 = vmatmul.mubr.msk.bf16.gmra.mrb[28].mxu1 %vm706_vm3, %v5396_v11  ;;  %4082 = vmatmul.mubr.msk.bf16.gmra.mrb[12].mxu0 %vm706_vm3, %v5146_v50  ;;  %v2723_v50 = vrot.slane %v267_v55, 5 }
 0x136   : > { %3949 = vmatprep.mubr.msk.bf16.mxu1 %vm706_vm3, %v5780_v27  ;;  %4085 = vmatprep.mubr.msk.bf16.mxu0 %vm706_vm3, %v5168_v20  ;;  %v2721_v20 = vsel %vm4860_vm7, %v3554_v37, %v2720_v34 }
 0x13d   : > { %3950 = vmatmul.mubr.msk.bf16.vlgmr.msra.gmra.mrb[16].mxu1 %vm706_vm3, %v5781_v6  ;;  %4086 = vmatmul.mubr.msk.bf16.gmra.mrb[16].mxu0 %vm706_vm3, %v5179_v0  ;;  %v2724_v0 = vsel %vm4860_vm7, %v2722_v41, %v2723_v50 }
 0x13e   : > { %3953 = vmatprep.mubr.msk.bf16.mxu1 %vm706_vm3, %v5782_v7  ;;  %4089 = vmatprep.mubr.msk.bf16.mxu0 %vm706_vm3, %v5220_v62  ;;  %v3556_v22 = vcombine.low %v2721_v20, %v2724_v0 }
 0x145   : > { %3954 = vmatmul.mubr.msk.bf16.gmra.mrb[20].mxu1 %vm706_vm3, %v5784_v46  ;;  %4090 = vmatmul.mubr.msk.bf16.gmra.mrb[20].mxu0 %vm706_vm3, %v5247_v31 }
 0x146   : > { %3957 = vmatprep.mubr.msk.bf16.mxu1 %vm706_vm3, %v5785_v12  ;;  %4093 = vmatprep.mubr.msk.bf16.mxu0 %vm706_vm3, %v5283_v44 }
 0x14d   : > { %3958 = vmatmul.mubr.msk.bf16.gmra.mrb[24].mxu1 %vm706_vm3, %v5113_v30  ;;  %4094 = vmatmul.mubr.msk.bf16.gmra.mrb[24].mxu0 %vm706_vm3, %v5293_v1 }
 0x14e   : > { %3961 = vmatprep.mubr.msk.bf16.mxu1 %vm706_vm3, %v5140_v63  ;;  %4097 = vmatprep.mubr.msk.bf16.mxu0 %vm706_vm3, %v5312_v19 }
 0x155   : > { %3962 = vmatmul.mubr.msk.bf16.gmra.mrb[28].mxu1 %vm706_vm3, %v5318_v16  ;;  %4098 = vmatmul.mubr.msk.bf16.gmra.mrb[28].mxu0 %vm706_vm3, %v3556_v22 }
 0x1d0   : > { %v3901_v30 = vpop.f32.mrb[0].mxu1 }
 0x1d1   : > { %v1684_v57 = vpop.f32.mrb[1].mxu1 }
 0x1d2   : > { %v3902_v62 = vpop.f32.mrb[2].mxu1 }
 0x1d3   : > { %v1687_v63 = vpop.f32.mrb[3].mxu1 }
 0x1d8   : > { %v3905_v5 = vpop.f32.mrb[4].mxu1 }
 0x1d9   : > { %v1700_v49 = vpop.f32.mrb[5].mxu1 }
 0x1da   : > { %v3906_v54 = vpop.f32.mrb[6].mxu1 }
 0x1db   : > { %v1703_v36 = vpop.f32.mrb[7].mxu1 }
 0x1e0   : > { %v3909_v45 = vpop.f32.mrb[8].mxu1 }
 0x1e1   : > { %v5560_v31 = vpop.f32.mrb[9].mxu1 }
 0x1e2   : > { %v5562_v26 = vpop.f32.mrb[10].mxu1 }
 0x1e3   : > { %v5564_v29 = vpop.f32.mrb[11].mxu1 }
 0x1e8   : > { %v5566_v44 = vpop.f32.mrb[12].mxu1 }
 0x1e9   : > { %v5568_v8 = vpop.f32.mrb[13].mxu1 }
 0x1ea   : > { %v5570_v1 = vpop.f32.mrb[14].mxu1 }
 0x1eb   : > { %v5572_v40 = vpop.f32.mrb[15].mxu1 }
 0x1f0   : > { %v4071_v19 = vpop.f32.mrb[0].mxu0 }
 0x1f1   : > { %v4103_v16 = vadd.f32 %v4071_v19, %v3901_v30  ;;  %v2770_v52 = vpop.f32.mrb[1].mxu0 }
 0x1f2   : > { %v4104_v3 = vadd.f32 %v2770_v52, %v1684_v57  ;;  %v4072_v4 = vpop.f32.mrb[2].mxu0 }
 0x1f3   : > { %v3612_v11 = vpack.c.bf16 %v4103_v16, %v4103_v16  ;;  %v4105_v21 = vadd.f32 %v4072_v4, %v3902_v62  ;;  %v2773_v13 = vpop.f32.mrb[3].mxu0  ;;  %v3129_v42 = vmul.f32 %v4103_v16, %v4103_v16 }
 0x1f4   : > { %v3610_v24 = vpack.c.bf16 %v4104_v3, %v4104_v3  ;;  %v4106_v9 = vadd.f32 %v2773_v13, %v1687_v63  ;;  %v3127_v51 = vmul.f32 %v4104_v3, %v4104_v3 }
 0x1f5   : > { %3060 = vst.msk [vmem:[%s5578_s11 + $0x8] sm:$0xf] %vm3057_vm8, %v3612_v11  ;;  %v3613_v10 = vpack.c.bf16 %v4105_v21, %v4105_v21  ;;  %v3130_v14 = vmul.f32 %v4105_v21, %v4105_v21 }
 0x1f6   : > { %3058 = vst.msk [vmem:[%s5578_s11] sm:$0xf] %vm3057_vm8, %v3610_v24  ;;  %v3611_v33 = vpack.c.bf16 %v4106_v9, %v4106_v9  ;;  %v3090_v39 = vadd.f32 %v4106_v9, %v4104_v3  ;;  %v3128_v58 = vmul.f32 %v4106_v9, %v4106_v9 }
 0x1f7   : > { %3061 = vst.msk [vmem:[%s5578_s11 + $0xc] sm:$0xf] %vm3057_vm8, %v3613_v10 }
 0x1f8   : > { %3059 = vst.msk [vmem:[%s5578_s11 + $0x4] sm:$0xf] %vm3057_vm8, %v3611_v33  ;;  %v3091_v15 = vadd.f32 %v4103_v16, %v3090_v39  ;;  %v3159_v27 = vadd.f32 %v3128_v58, %v3127_v51  ;;  %v4075_v6 = vpop.f32.mrb[4].mxu0 }
 0x1f9   : > { %v4107_v7 = vadd.f32 %v4075_v6, %v3905_v5  ;;  %v2786_v60 = vpop.f32.mrb[5].mxu0 }
 0x1fa   : > { %v3160_v28 = vadd.f32 %v3159_v27, %v3129_v42  ;;  %v4108_v25 = vadd.f32 %v2786_v60, %v1700_v49  ;;  %v3092_v38 = vadd.f32 %v4105_v21, %v3091_v15  ;;  %v4076_v46 = vpop.f32.mrb[6].mxu0 }
 0x1fb   : > { %v3616_v47 = vpack.c.bf16 %v4107_v7, %v4107_v7  ;;  %v4109_v32 = vadd.f32 %v4076_v46, %v3906_v54  ;;  %v2789_v18 = vpop.f32.mrb[7].mxu0  ;;  %v3133_v17 = vmul.f32 %v4107_v7, %v4107_v7 }
 0x1fc   : > { %v3614_v43 = vpack.c.bf16 %v4108_v25, %v4108_v25  ;;  %v3093_v55 = vadd.f32 %v4108_v25, %v3092_v38  ;;  %v3131_v12 = vmul.f32 %v4108_v25, %v4108_v25  ;;  %v3161_v23 = vadd.f32 %v3160_v28, %v3130_v14 }
 0x1fd   : > { %3064 = vst.msk [vmem:[%s5578_s11 + $0x18] sm:$0xf] %vm3057_vm8, %v3616_v47  ;;  %v3617_v59 = vpack.c.bf16 %v4109_v32, %v4109_v32  ;;  %v4110_v35 = vadd.f32 %v2789_v18, %v1703_v36  ;;  %v3134_v22 = vmul.f32 %v4109_v32, %v4109_v32 }
 0x1fe   : > { %3062 = vst.msk [vmem:[%s5578_s11 + $0x10] sm:$0xf] %vm3057_vm8, %v3614_v43  ;;  %v3162_v48 = vadd.f32 %v3161_v23, %v3131_v12 }
 0x1ff   : > { %3065 = vst.msk [vmem:[%s5578_s11 + $0x1c] sm:$0xf] %vm3057_vm8, %v3617_v59  ;;  %v3615_v2 = vpack.c.bf16 %v4110_v35, %v4110_v35  ;;  %v3094_v61 = vadd.f32 %v4110_v35, %v3093_v55  ;;  %v3132_v56 = vmul.f32 %v4110_v35, %v4110_v35 }
 0x200   : > { %v4079_v53 = vpop.f32.mrb[8].mxu0 }
 0x201   : > { %3063 = vst.msk [vmem:[%s5578_s11 + $0x14] sm:$0xf] %vm3057_vm8, %v3615_v2  ;;  %v3095_v34 = vadd.f32 %v4107_v7, %v3094_v61  ;;  %v3163_v37 = vadd.f32 %v3162_v48, %v3132_v56  ;;  %v4111_v41 = vadd.f32 %v4079_v53, %v3909_v45  ;;  %v2802_v50 = vpop.f32.mrb[9].mxu0 }
 0x202   : > { %v4112_v20 = vadd.f32 %v2802_v50, %v5560_v31  ;;  %v4080_v0 = vpop.f32.mrb[10].mxu0 }
 0x203   : > { %v3164_v30 = vadd.f32 %v3163_v37, %v3133_v17  ;;  %v3620_v57 = vpack.c.bf16 %v4111_v41, %v4111_v41  ;;  %v3096_v62 = vadd.f32 %v4109_v32, %v3095_v34  ;;  %v2805_v63 = vpop.f32.mrb[11].mxu0  ;;  %v4113_v54 = vadd.f32 %v4080_v0, %v5562_v26 }
 0x204   : > { %v3618_v5 = vpack.c.bf16 %v4112_v20, %v4112_v20  ;;  %v3135_v49 = vmul.f32 %v4112_v20, %v4112_v20  ;;  %v4114_v36 = vadd.f32 %v2805_v63, %v5564_v29  ;;  %v3137_v21 = vmul.f32 %v4111_v41, %v4111_v41 }
 0x205   : > { %3068 = vst.msk [vmem:[%s5578_s11 + $0x28] sm:$0xf] %vm3057_vm8, %v3620_v57  ;;  %v3097_v45 = vadd.f32 %v4112_v20, %v3096_v62  ;;  %v3165_v19 = vadd.f32 %v3164_v30, %v3134_v22  ;;  %v3621_v31 = vpack.c.bf16 %v4113_v54, %v4113_v54  ;;  %v3138_v51 = vmul.f32 %v4113_v54, %v4113_v54 }
 0x206   : > { %3066 = vst.msk [vmem:[%s5578_s11 + $0x20] sm:$0xf] %vm3057_vm8, %v3618_v5  ;;  %v3619_v16 = vpack.c.bf16 %v4114_v36, %v4114_v36  ;;  %v3136_v52 = vmul.f32 %v4114_v36, %v4114_v36 }
 0x207   : > { %v3166_v3 = vadd.f32 %v3165_v19, %v3135_v49  ;;  %v3098_v4 = vadd.f32 %v4114_v36, %v3097_v45  ;;  %3069 = vst.msk [vmem:[%s5578_s11 + $0x2c] sm:$0xf] %vm3057_vm8, %v3621_v31 }
 0x208   : > { %3067 = vst.msk [vmem:[%s5578_s11 + $0x24] sm:$0xf] %vm3057_vm8, %v3619_v16  ;;  %v4083_v11 = vpop.f32.mrb[12].mxu0 }
 0x209   : > { %v3099_v26 = vadd.f32 %v4111_v41, %v3098_v4  ;;  %v3167_v29 = vadd.f32 %v3166_v3, %v3136_v52  ;;  %v4115_v13 = vadd.f32 %v4083_v11, %v5566_v44  ;;  %v2818_v24 = vpop.f32.mrb[13].mxu0 }
 0x20a   : > { %v4116_v9 = vadd.f32 %v2818_v24, %v5568_v8  ;;  %v4084_v10 = vpop.f32.mrb[14].mxu0 }
 0x20b   : > { %v3168_v33 = vadd.f32 %v3167_v29, %v3137_v21  ;;  %v3624_v39 = vpack.c.bf16 %v4115_v13, %v4115_v13  ;;  %v3100_v58 = vadd.f32 %v4113_v54, %v3099_v26  ;;  %v2821_v42 = vpop.f32.mrb[15].mxu0  ;;  %v4117_v6 = vadd.f32 %v4084_v10, %v5570_v1 }
 0x20c   : > { %v3622_v15 = vpack.c.bf16 %v4116_v9, %v4116_v9  ;;  %v3139_v27 = vmul.f32 %v4116_v9, %v4116_v9  ;;  %v4118_v7 = vadd.f32 %v2821_v42, %v5572_v40  ;;  %v3141_v1 = vmul.f32 %v4115_v13, %v4115_v13 }
 0x20d   : > { %3072 = vst.msk [vmem:[%s5578_s11 + $0x38] sm:$0xf] %vm3057_vm8, %v3624_v39  ;;  %v3101_v44 = vadd.f32 %v4116_v9, %v3100_v58  ;;  %v3169_v60 = vadd.f32 %v3168_v33, %v3138_v51  ;;  %v3625_v8 = vpack.c.bf16 %v4117_v6, %v4117_v6  ;;  %v3142_v35 = vmul.f32 %v4117_v6, %v4117_v6 }
 0x20e   : > { %3070 = vst.msk [vmem:[%s5578_s11 + $0x30] sm:$0xf] %vm3057_vm8, %v3622_v15  ;;  %v3623_v14 = vpack.c.bf16 %v4118_v7, %v4118_v7  ;;  %v3140_v28 = vmul.f32 %v4118_v7, %v4118_v7 }
 0x20f   : > { %v3170_v25 = vadd.f32 %v3169_v60, %v3139_v27  ;;  %v3102_v38 = vadd.f32 %v4118_v7, %v3101_v44  ;;  %3073 = vst.msk [vmem:[%s5578_s11 + $0x3c] sm:$0xf] %vm3057_vm8, %v3625_v8 }
 0x210   : > { %3071 = vst.msk [vmem:[%s5578_s11 + $0x34] sm:$0xf] %vm3057_vm8, %v3623_v14  ;;  %v3951_v46 = vpop.f32.mrb[16].mxu1  ;;  %v4087_v47 = vpop.f32.mrb[16].mxu0 }
 0x211   : > { %v3103_v32 = vadd.f32 %v4115_v13, %v3102_v38  ;;  %v3171_v40 = vadd.f32 %v3170_v25, %v3140_v28  ;;  %v4119_v18 = vadd.f32 %v4087_v47, %v3951_v46  ;;  %v1976_v43 = vpop.f32.mrb[17].mxu1  ;;  %v2834_v55 = vpop.f32.mrb[17].mxu0 }
 0x212   : > { %v4120_v12 = vadd.f32 %v2834_v55, %v1976_v43  ;;  %v3952_v23 = vpop.f32.mrb[18].mxu1  ;;  %v4088_v59 = vpop.f32.mrb[18].mxu0 }
 0x213   : > { %v3172_v48 = vadd.f32 %v3171_v40, %v3141_v1  ;;  %v3628_v2 = vpack.c.bf16 %v4119_v18, %v4119_v18  ;;  %v3104_v61 = vadd.f32 %v4117_v6, %v3103_v32  ;;  %v1979_v56 = vpop.f32.mrb[19].mxu1  ;;  %v2837_v53 = vpop.f32.mrb[19].mxu0  ;;  %v4121_v37 = vadd.f32 %v4088_v59, %v3952_v23 }
 0x214   : > { %v3626_v17 = vpack.c.bf16 %v4120_v12, %v4120_v12  ;;  %v3143_v34 = vmul.f32 %v4120_v12, %v4120_v12  ;;  %v4122_v41 = vadd.f32 %v2837_v53, %v1979_v56  ;;  %v3145_v49 = vmul.f32 %v4119_v18, %v4119_v18 }
 0x215   : > { %3076 = vst.msk [vmem:[%s5578_s11 + $0x48] sm:$0xf] %vm3057_vm8, %v3628_v2  ;;  %v3105_v50 = vadd.f32 %v4120_v12, %v3104_v61  ;;  %v3173_v20 = vadd.f32 %v3172_v48, %v3142_v35  ;;  %v3629_v0 = vpack.c.bf16 %v4121_v37, %v4121_v37  ;;  %v3146_v4 = vmul.f32 %v4121_v37, %v4121_v37 }
 0x216   : > { %3074 = vst.msk [vmem:[%s5578_s11 + $0x40] sm:$0xf] %vm3057_vm8, %v3626_v17  ;;  %v3627_v22 = vpack.c.bf16 %v4122_v41, %v4122_v41  ;;  %v3144_v30 = vmul.f32 %v4122_v41, %v4122_v41 }
 0x217   : > { %v3174_v57 = vadd.f32 %v3173_v20, %v3143_v34  ;;  %v3106_v62 = vadd.f32 %v4122_v41, %v3105_v50  ;;  %3077 = vst.msk [vmem:[%s5578_s11 + $0x4c] sm:$0xf] %vm3057_vm8, %v3629_v0 }
 0x218   : > { %3075 = vst.msk [vmem:[%s5578_s11 + $0x44] sm:$0xf] %vm3057_vm8, %v3627_v22  ;;  %v3955_v63 = vpop.f32.mrb[20].mxu1  ;;  %v4091_v5 = vpop.f32.mrb[20].mxu0 }
 0x219   : > { %v3107_v54 = vadd.f32 %v4119_v18, %v3106_v62  ;;  %v3175_v36 = vadd.f32 %v3174_v57, %v3144_v30  ;;  %v4123_v45 = vadd.f32 %v4091_v5, %v3955_v63  ;;  %v1992_v19 = vpop.f32.mrb[21].mxu1  ;;  %v2850_v31 = vpop.f32.mrb[21].mxu0 }
 0x21a   : > { %v4124_v16 = vadd.f32 %v2850_v31, %v1992_v19  ;;  %v3956_v52 = vpop.f32.mrb[22].mxu1  ;;  %v4092_v3 = vpop.f32.mrb[22].mxu0 }
 0x21b   : > { %v3176_v11 = vadd.f32 %v3175_v36, %v3145_v49  ;;  %v3632_v21 = vpack.c.bf16 %v4123_v45, %v4123_v45  ;;  %v3108_v26 = vadd.f32 %v4121_v37, %v3107_v54  ;;  %v1995_v29 = vpop.f32.mrb[23].mxu1  ;;  %v2853_v13 = vpop.f32.mrb[23].mxu0  ;;  %v4125_v10 = vadd.f32 %v4092_v3, %v3956_v52 }
 0x21c   : > { %v3630_v24 = vpack.c.bf16 %v4124_v16, %v4124_v16  ;;  %v3147_v9 = vmul.f32 %v4124_v16, %v4124_v16  ;;  %v4126_v51 = vadd.f32 %v2853_v13, %v1995_v29  ;;  %v3149_v60 = vmul.f32 %v4123_v45, %v4123_v45 }
 0x21d   : > { %3080 = vst.msk [vmem:[%s5578_s11 + $0x58] sm:$0xf] %vm3057_vm8, %v3632_v21  ;;  %v3109_v33 = vadd.f32 %v4124_v16, %v3108_v26  ;;  %v3177_v39 = vadd.f32 %v3176_v11, %v3146_v4  ;;  %v3633_v58 = vpack.c.bf16 %v4125_v10, %v4125_v10  ;;  %v3150_v32 = vmul.f32 %v4125_v10, %v4125_v10 }
 0x21e   : > { %3078 = vst.msk [vmem:[%s5578_s11 + $0x50] sm:$0xf] %vm3057_vm8, %v3630_v24  ;;  %v3631_v42 = vpack.c.bf16 %v4126_v51, %v4126_v51  ;;  %v3148_v15 = vmul.f32 %v4126_v51, %v4126_v51 }
 0x21f   : > { %v3178_v27 = vadd.f32 %v3177_v39, %v3147_v9  ;;  %v3110_v6 = vadd.f32 %v4126_v51, %v3109_v33  ;;  %3081 = vst.msk [vmem:[%s5578_s11 + $0x5c] sm:$0xf] %vm3057_vm8, %v3633_v58 }
 0x220   : > { %3079 = vst.msk [vmem:[%s5578_s11 + $0x54] sm:$0xf] %vm3057_vm8, %v3631_v42  ;;  %v3959_v7 = vpop.f32.mrb[24].mxu1  ;;  %v4095_v44 = vpop.f32.mrb[24].mxu0 }
 0x221   : > { %v3111_v8 = vadd.f32 %v4123_v45, %v3110_v6  ;;  %v3179_v14 = vadd.f32 %v3178_v27, %v3148_v15  ;;  %v4127_v28 = vadd.f32 %v4095_v44, %v3959_v7  ;;  %v2008_v25 = vpop.f32.mrb[25].mxu1  ;;  %v2866_v38 = vpop.f32.mrb[25].mxu0 }
 0x222   : > { %v4128_v46 = vadd.f32 %v2866_v38, %v2008_v25  ;;  %v3960_v47 = vpop.f32.mrb[26].mxu1  ;;  %v4096_v1 = vpop.f32.mrb[26].mxu0 }
 0x223   : > { %v3180_v40 = vadd.f32 %v3179_v14, %v3149_v60  ;;  %v3636_v18 = vpack.c.bf16 %v4127_v28, %v4127_v28  ;;  %v3112_v43 = vadd.f32 %v4125_v10, %v3111_v8  ;;  %v2011_v55 = vpop.f32.mrb[27].mxu1  ;;  %v2869_v12 = vpop.f32.mrb[27].mxu0  ;;  %v4129_v35 = vadd.f32 %v4096_v1, %v3960_v47 }
 0x224   : > { %v3634_v23 = vpack.c.bf16 %v4128_v46, %v4128_v46  ;;  %v3151_v59 = vmul.f32 %v4128_v46, %v4128_v46  ;;  %v4130_v48 = vadd.f32 %v2869_v12, %v2011_v55  ;;  %v3153_v20 = vmul.f32 %v4127_v28, %v4127_v28 }
 0x225   : > { %3084 = vst.msk [vmem:[%s5578_s11 + $0x68] sm:$0xf] %vm3057_vm8, %v3636_v18  ;;  %v3113_v2 = vadd.f32 %v4128_v46, %v3112_v43  ;;  %v3181_v61 = vadd.f32 %v3180_v40, %v3150_v32  ;;  %v3637_v56 = vpack.c.bf16 %v4129_v35, %v4129_v35  ;;  %v3154_v54 = vmul.f32 %v4129_v35, %v4129_v35 }
 0x226   : > { %3082 = vst.msk [vmem:[%s5578_s11 + $0x60] sm:$0xf] %vm3057_vm8, %v3634_v23  ;;  %v3635_v53 = vpack.c.bf16 %v4130_v48, %v4130_v48  ;;  %v3152_v17 = vmul.f32 %v4130_v48, %v4130_v48 }
 0x227   : > { %v3182_v34 = vadd.f32 %v3181_v61, %v3151_v59  ;;  %v3114_v37 = vadd.f32 %v4130_v48, %v3113_v2  ;;  %3085 = vst.msk [vmem:[%s5578_s11 + $0x6c] sm:$0xf] %vm3057_vm8, %v3637_v56 }
 0x228   : > { %3083 = vst.msk [vmem:[%s5578_s11 + $0x64] sm:$0xf] %vm3057_vm8, %v3635_v53  ;;  %v3963_v41 = vpop.f32.mrb[28].mxu1  ;;  %v4099_v50 = vpop.f32.mrb[28].mxu0 }
 0x229   : > { %v3115_v0 = vadd.f32 %v4127_v28, %v3114_v37  ;;  %v3183_v22 = vadd.f32 %v3182_v34, %v3152_v17  ;;  %v4131_v30 = vadd.f32 %v4099_v50, %v3963_v41  ;;  %v2024_v57 = vpop.f32.mrb[29].mxu1  ;;  %v2882_v62 = vpop.f32.mrb[29].mxu0 }
 0x22a   : > { %v4132_v63 = vadd.f32 %v2882_v62, %v2024_v57  ;;  %v3964_v5 = vpop.f32.mrb[30].mxu1  ;;  %v4100_v49 = vpop.f32.mrb[30].mxu0 }
 0x22b   : > { %v3184_v36 = vadd.f32 %v3183_v22, %v3153_v20  ;;  %v3640_v45 = vpack.c.bf16 %v4131_v30, %v4131_v30  ;;  %v3116_v19 = vadd.f32 %v4129_v35, %v3115_v0  ;;  %v2027_v31 = vpop.f32.mrb[31].mxu1  ;;  %v2885_v16 = vpop.f32.mrb[31].mxu0  ;;  %v4133_v4 = vadd.f32 %v4100_v49, %v3964_v5 }
 0x22c   : > { %v3638_v52 = vpack.c.bf16 %v4132_v63, %v4132_v63  ;;  %v3155_v3 = vmul.f32 %v4132_v63, %v4132_v63  ;;  %v4134_v11 = vadd.f32 %v2885_v16, %v2027_v31  ;;  %v3157_v51 = vmul.f32 %v4131_v30, %v4131_v30 }
 0x22d   : > { %3088 = vst.msk [vmem:[%s5578_s11 + $0x78] sm:$0xf] %vm3057_vm8, %v3640_v45  ;;  %v3117_v21 = vadd.f32 %v4132_v63, %v3116_v19  ;;  %v3185_v26 = vadd.f32 %v3184_v36, %v3154_v54  ;;  %v3641_v29 = vpack.c.bf16 %v4133_v4, %v4133_v4  ;;  %v3158_v58 = vmul.f32 %v4133_v4, %v4133_v4 }
 0x22e   : > { %3086 = vst.msk [vmem:[%s5578_s11 + $0x70] sm:$0xf] %vm3057_vm8, %v3638_v52  ;;  %v3639_v13 = vpack.c.bf16 %v4134_v11, %v4134_v11  ;;  %v3156_v24 = vmul.f32 %v4134_v11, %v4134_v11 }
 0x22f   : > { %v3186_v9 = vadd.f32 %v3185_v26, %v3155_v3  ;;  %v3118_v10 = vadd.f32 %v4134_v11, %v3117_v21  ;;  %3089 = vst.msk [vmem:[%s5578_s11 + $0x7c] sm:$0xf] %vm3057_vm8, %v3641_v29 }
 0x230   : > { %3087 = vst.msk [vmem:[%s5578_s11 + $0x74] sm:$0xf] %vm3057_vm8, %v3639_v13 }
 0x231   : > { %v3119_v33 = vadd.f32 %v4131_v30, %v3118_v10  ;;  %v3187_v39 = vadd.f32 %v3186_v9, %v3156_v24 }
 0x233   : > { %v3120_v42 = vadd.f32 %v4133_v4, %v3119_v33  ;;  %v3188_v15 = vadd.f32 %v3187_v39, %v3157_v51 }
 0x235   : > { %v3121_v27 = vrot.slane %v3120_v42, 4  ;;  %v3189_v6 = vadd.f32 %v3188_v15, %v3158_v58 }
 0x237   : > { %v3122_v7 = vadd.f32 %v3121_v27, %v3120_v42  ;;  %v3190_v44 = vrot.slane %v3189_v6, 4 }
 0x239   : > { %v3123_v60 = vrot.slane %v3122_v7, 2  ;;  %v3191_v8 = vadd.f32 %v3190_v44, %v3189_v6 }
 0x23b   : > { %v3124_v14 = vadd.f32 %v3123_v60, %v3122_v7  ;;  %v3192_v28 = vrot.slane %v3191_v8, 2 }
 0x23d   : > { %v3125_v25 = vrot.slane %v3124_v14, 1  ;;  %v3193_v38 = vadd.f32 %v3192_v28, %v3191_v8 }
 0x23f   : > { %v3194_v46 = vrot.slane %v3193_v38, 1  ;;  %v3126_v47 = vadd.f32 %v3125_v25, %v3124_v14 }
 0x241   : > { %v3195_v1 = vadd.f32 %v3194_v46, %v3193_v38 }
 0x243   : > { %v3197_v32 = vsel %vm3196_vm9, %v3126_v47, %v3195_v1 }
 0x244   : > { %3198 = vst [vmem:[%s192_s21] sm:$0x3] %v3197_v32 }
 0x245   : > { %4460 = shalt.err (!%p4457_p5)
}
 0x246   : > { %s4461_s7 = scalar_lea.hbm %s5656_s28, 32  ;;  %s4465_s10 = scalar_lea.hbm %s5706_s3, 64 }
 0x247   : > { %p4462_p6 = scmp.ne.s32.totalorder %s5656_s28, %s4461_s7  ;;  %p4466_p10 = scmp.lt.u32.totalorder %s5656_s28, %s5706_s3 }
 0x248   : > { %p4467_p11 = scmp.lt.u32.totalorder %s4465_s10, %s4461_s7  ;;  %p4469_p13 = scmp.lt.u32.totalorder %s4461_s7, %s5656_s28 }
 0x249   : > { %p4463_p7 = pnand %p4462_p6, %p4588_p4 }
 0x24a   : > { %p4468_p12 = por %p4467_p11, %p4466_p10 }
 0x24b   : > { %p4464_p9 = pneg %p4463_p7 }
 0x24c   : > { %p4470_p0 = por %p4469_p13, %p4468_p12 }
 0x24e   : > { %p4471_p1 = pnand %p4470_p0, %p4464_p9 }
 0x250   : > { %4474 = shalt.err (!%p4471_p1)
}
 0x251   : > { %4370 = dma.vmem_to_hbm [thread:$0]  (%p4588_p4), %s5658_s23, 32, %s5656_s28, %s3210_s29  }
 0x252 PF: > { %p4376_p2 = scmp.ge.s32.totalorder %s4525_s17, 2  ;;  %s3253_s18 = sand.u32 1, %s4505_s12  }
 0x253   : > { %s3254_s19 = scalar_lea.sflag [#allocation3], %s3253_s18 }
 0x254   : > { %p4373_p3 = pnand %p4376_p2, %p4595_p8 }
 0x256   : > { %4500 = dma.done.wait (!%p4373_p3), %s3254_s19, 32  }
 0x257   : > { %4502 = vsyncadd (!%p4373_p3), %s3254_s19, 4294967264  ;;  %s17_s17 = sadd.s32 1, %s4525_s17   ;;  %s5786_s12 = smov %s4509_s13 }
 0x258   : > { %p14_p5 = scmp.ge.s32.totalorder %s17_s17, 4   ;;  %s5787_s13 = smov %s4513_s14 }
 0x259   : > { %s5788_s14 = smov %s4601_s25  ;;  %s5789_s15 = smov %s4521_s16 }
 0x25a   : > { %s5790_s16 = smov %s5792_s20  ;;  %16 = sbr.rel (!%p14_p5) target bundleno = 4 (0x4), region = 84 }
 0x261   :  { %3259 = vsyncpa [#allocation3], 1 }
 0x262   :  { %3261 = vsyncpa [#allocation3 + $0x1], 1 }

</bundles_post_ra>
